<compile_context>
chip_gen: v6e
topology: v6e:2x2x1
jax: 0.10.0
libtpu: 0.0.40
codegen_flags: <defaults>
</compile_context>

<pallas_src>
import functools
import math

import jax
import jax.numpy as jnp
from jax import lax
from jax.experimental import pallas as pl
from jax.experimental.pallas import tpu as pltpu


def _rmsnorm(x, w, eps):
    # x: (rows, D) f32, w: (1, D) f32
    ms = jnp.mean(x * x, axis=-1, keepdims=True)
    return w * (x * lax.rsqrt(ms + eps))


def encoder_kernel(x_ref, wqkv_hbm, wo_hbm, w13_hbm, w2_hbm, an_ref, fn_ref,
                   out_ref,
                   wqkv_v, wo_v, w13_v, w2_v, attn_sc, w_sems,
                   *, n_heads, seq_len, kv_blk, ff_blk, eps):
    rows, D = x_ref.shape                     # rows = Bt * S
    S = seq_len
    bt = rows // S
    dk = D // n_heads
    H = w2_v.shape[0]
    scale = 1.0 / math.sqrt(dk)
    n_kv = S // kv_blk
    n_ff = H // ff_blk
    is_first = pl.program_id(1) == 0          # first iteration on THIS core

    # ---- stage bf16 weights into persistent VMEM once per core.  Start all
    # DMAs now; waits are staggered below at each weight's first use so the
    # transfers overlap with compute instead of stalling step 0 up front.
    @pl.when(is_first)
    def _():
        pltpu.make_async_copy(wqkv_hbm, wqkv_v, w_sems.at[0]).start()
        pltpu.make_async_copy(wo_hbm, wo_v, w_sems.at[1]).start()
        pltpu.make_async_copy(w13_hbm, w13_v, w_sems.at[2]).start()
        pltpu.make_async_copy(w2_hbm, w2_v, w_sems.at[3]).start()

    x = x_ref[...].astype(jnp.float32)        # (rows, D)

    # ---- attention sub-block (pre-RMSNorm) ----
    x_n = _rmsnorm(x, an_ref[...], eps).astype(jnp.bfloat16)

    @pl.when(is_first)
    def _():
        pltpu.make_async_copy(wqkv_hbm, wqkv_v, w_sems.at[0]).wait()

    qkv = jnp.dot(x_n, wqkv_v[...], preferred_element_type=jnp.float32)  # (rows, 3D)

    @pl.when(is_first)
    def _():
        pltpu.make_async_copy(wo_hbm, wo_v, w_sems.at[1]).wait()

    contract_last = (((1,), (1,)), ((), ()))
    for bi in range(bt):                      # attention is per batch element
        r0 = bi * S
        acc_bD = jnp.zeros((S, D), jnp.float32)
        for h in range(n_heads):
            lo = h * dk
            # slice per head straight out of the f32 qkv slab (fold 1/sqrt(dk) into q)
            qh = (qkv[r0:r0 + S, lo:lo + dk] * scale).astype(jnp.bfloat16)
            m_i = jnp.full((S, 1), -jnp.inf, jnp.float32)
            l_i = jnp.zeros((S, 1), jnp.float32)
            acc = jnp.zeros((S, dk), jnp.float32)
            for kb in range(n_kv):            # online softmax over KV blocks
                k0 = r0 + kb * kv_blk
                kh = qkv[k0:k0 + kv_blk, D + lo:D + lo + dk].astype(jnp.bfloat16)
                vh = qkv[k0:k0 + kv_blk, 2 * D + lo:2 * D + lo + dk].astype(jnp.bfloat16)
                # contract last dims of q and k -> no explicit kh.T transpose
                s = lax.dot_general(qh, kh, contract_last,
                                    preferred_element_type=jnp.float32)  # (S, kv_blk)
                m_new = jnp.maximum(m_i, jnp.max(s, axis=-1, keepdims=True))
                alpha = jnp.exp(m_i - m_new)
                p = jnp.exp(s - m_new)
                l_i = alpha * l_i + jnp.sum(p, axis=-1, keepdims=True)
                acc = alpha * acc + jnp.dot(p.astype(jnp.bfloat16), vh,
                                            preferred_element_type=jnp.float32)
                m_i = m_new
            # normalize AFTER the PV matmul: (S, dk) multiply, not (S, S)
            oh = acc * pl.reciprocal(l_i, approx=True)
            # fold W_O per head -> full-lane-width accumulation, no attn concat
            acc_bD = acc_bD + jnp.dot(oh.astype(jnp.bfloat16), wo_v[lo:lo + dk, :],
                                      preferred_element_type=jnp.float32)
        attn_sc[r0:r0 + S, :] = acc_bD        # lane-dense (full D width) store

    h_res = x + attn_sc[...]

    # ---- feed-forward sub-block (SwiGLU, pre-RMSNorm), H-tiled ----
    hn = _rmsnorm(h_res, fn_ref[...], eps).astype(jnp.bfloat16)

    @pl.when(is_first)
    def _():
        pltpu.make_async_copy(w13_hbm, w13_v, w_sems.at[2]).wait()
        pltpu.make_async_copy(w2_hbm, w2_v, w_sems.at[3]).wait()

    ff = jnp.zeros((rows, D), jnp.float32)
    for c in range(n_ff):
        c0 = c * ff_blk
        a1 = jnp.dot(hn, w13_v[:, c0:c0 + ff_blk],
                     preferred_element_type=jnp.float32)
        a3 = jnp.dot(hn, w13_v[:, H + c0:H + c0 + ff_blk],
                     preferred_element_type=jnp.float32)
        g = (a1 * jax.nn.sigmoid(a1) * a3).astype(jnp.bfloat16)   # SiLU(a1) * a3
        ff = ff + jnp.dot(g, w2_v[c0:c0 + ff_blk, :],
                          preferred_element_type=jnp.float32)

    out_ref[...] = (h_res + ff).astype(out_ref.dtype)


def prepare_weights(params):
    """One-time projection fusion + bf16 cast (hoisted out of the per-call path)."""
    return {
        "wqkv": jnp.concatenate([params["wq"], params["wk"], params["wv"]],
                                axis=1).astype(jnp.bfloat16),
        "w13": jnp.concatenate([params["w1"], params["w3"]],
                               axis=1).astype(jnp.bfloat16),
        "wo": params["wo"].astype(jnp.bfloat16),
        "w2": params["w2"].astype(jnp.bfloat16),
        "attn_norm": params["attn_norm"],
        "ffn_norm": params["ffn_norm"],
    }


def _pick_batch_tile(B, S, target_rows):
    """Largest divisor of B such that Bt*S stays near target_rows (MXU fill)."""
    if S >= target_rows:
        return 1
    want = max(1, target_rows // S)
    bt = 1
    for cand in range(1, min(B, want) + 1):
        if B % cand == 0:
            bt = cand
    return bt


def _vmem_limit_bytes():
    """Generation-aware scoped-VMEM cap: physical capacity minus ~8 MiB headroom."""
    cap = 64 * 2 ** 20
    try:
        cap = getattr(pltpu.get_tpu_info(), "vmem_capacity_bytes", cap)
    except Exception:
        pass
    return int(max(32 * 2 ** 20, cap - 8 * 2 ** 20))


def encoder_forward(x, weights, n_heads, *, eps=1e-5, num_cores=1,
                    kv_block=512, ff_block=512, target_rows=256):
    B, S, D = x.shape
    H = weights["w2"].shape[0]

    bt = _pick_batch_tile(B, S, target_rows)
    n_tiles = B // bt
    if n_tiles % num_cores != 0:
        num_cores = 1
    tpc = n_tiles // num_cores                 # batch tiles per core

    kv_blk = S if (S <= kv_block or S % kv_block) else kv_block
    ff_blk = H if (H <= ff_block or H % ff_block) else ff_block

    rows = bt * S
    x2 = x.reshape(B * S, D)                   # free host-side reshape

    kernel = functools.partial(encoder_kernel, n_heads=n_heads, seq_len=S,
                               kv_blk=kv_blk, ff_blk=ff_blk, eps=eps)

    tile_map = lambda c, b: (c * tpc + b, 0)   # global batch-tile index
    wmap = lambda c, b: (0, 0)

    # Cost estimate (matmul flops + transcendentals + HBM traffic).
    flops = 2 * B * S * (3 * D * D + 2 * S * D + D * D + 2 * D * H + H * D)
    transcendentals = B * (n_heads * S * S + S * H + 2 * S)
    bytes_accessed = (2 * 4 * B * S * D
                      + 2 * (3 * D * D + D * D + 2 * D * H + H * D)
                      + 2 * 4 * D)

    out2 = pl.pallas_call(
        kernel,
        out_shape=jax.ShapeDtypeStruct((B * S, D), x.dtype),
        grid_spec=pltpu.PrefetchScalarGridSpec(
            num_scalar_prefetch=0,
            grid=(num_cores, tpc),
            in_specs=[
                pl.BlockSpec((rows, D), tile_map),     # x (Bt batch elems / step)
                pl.BlockSpec(memory_space=pl.ANY),     # wqkv (HBM, staged manually)
                pl.BlockSpec(memory_space=pl.ANY),     # wo
                pl.BlockSpec(memory_space=pl.ANY),     # w13
                pl.BlockSpec(memory_space=pl.ANY),     # w2
                pl.BlockSpec((1, D), wmap),            # attention_norm
                pl.BlockSpec((1, D), wmap),            # ffn_norm
            ],
            out_specs=pl.BlockSpec((rows, D), tile_map),
            scratch_shapes=[
                pltpu.VMEM((D, 3 * D), jnp.bfloat16),  # wqkv (persistent, per core)
                pltpu.VMEM((D, D), jnp.bfloat16),      # wo
                pltpu.VMEM((D, 2 * H), jnp.bfloat16),  # w13
                pltpu.VMEM((H, D), jnp.bfloat16),      # w2
                pltpu.VMEM((rows, D), jnp.float32),    # attention output slab
                pltpu.SemaphoreType.DMA((4,)),         # weight staging sems
            ],
        ),
        compiler_params=pltpu.CompilerParams(
            # Leading axis is parallel (megacore on v7x shards it); weight
            # staging is gated on the per-core first inner iteration so every
            # core stages its own VMEM copy.
            dimension_semantics=("parallel", "arbitrary"),
            vmem_limit_bytes=_vmem_limit_bytes(),
        ),
        cost_estimate=pl.CostEstimate(
            flops=int(flops),
            transcendentals=int(transcendentals),
            bytes_accessed=int(bytes_accessed),
        ),
    )(x2, weights["wqkv"], weights["wo"], weights["w13"], weights["w2"],
      weights["attn_norm"], weights["ffn_norm"])

    return out2.reshape(B, S, D)


def encoder_ref(x, params, n_heads, eps=1e-5):
    """Pure-JAX f32 reference mirroring the PyTorch Encoder.forward (mask=None)."""
    def rms(t, w):
        return w * (t * lax.rsqrt(jnp.mean(t * t, -1, keepdims=True) + eps))
    B, S, D = x.shape
    dk = D // n_heads
    xn = rms(x, params["attn_norm"])
    q = xn @ params["wq"]
    k = xn @ params["wk"]
    v = xn @ params["wv"]
    q = q.reshape(B, S, n_heads, dk).transpose(0, 2, 1, 3)
    k = k.reshape(B, S, n_heads, dk).transpose(0, 2, 1, 3)
    v = v.reshape(B, S, n_heads, dk).transpose(0, 2, 1, 3)
    s = jnp.einsum("bhqd,bhkd->bhqk", q, k) / math.sqrt(dk)
    p = jax.nn.softmax(s, axis=-1)
    o = jnp.einsum("bhqk,bhkd->bhqd", p, v)
    o = o.transpose(0, 2, 1, 3).reshape(B, S, D) @ params["wo"]
    h = x + o
    hn = rms(h, params["ffn_norm"])
    ff = (jax.nn.silu(hn @ params["w1"]) * (hn @ params["w3"])) @ params["w2"]
    return h + ff


def init_params(key, D):
    H = 4 * D
    keys = jax.random.split(key, 7)
    scale = 0.05
    return {
        "wq": scale * jax.random.normal(keys[0], (D, D), jnp.float32),
        "wk": scale * jax.random.normal(keys[1], (D, D), jnp.float32),
        "wv": scale * jax.random.normal(keys[2], (D, D), jnp.float32),
        "wo": scale * jax.random.normal(keys[3], (D, D), jnp.float32),
        "w1": scale * jax.random.normal(keys[4], (D, H), jnp.float32),
        "w3": scale * jax.random.normal(keys[5], (D, H), jnp.float32),
        "w2": scale * jax.random.normal(keys[6], (H, D), jnp.float32),
        # RMSNorm weights initialized to ones (nn.Parameter(torch.ones(dim)))
        "attn_norm": jnp.ones((1, D), jnp.float32),
        "ffn_norm": jnp.ones((1, D), jnp.float32),
    }


if __name__ == "__main__":
    B, S, D, n_heads = 2, 8, 32, 4
    key = jax.random.PRNGKey(0)
    kx, kp = jax.random.split(key)
    x = jax.random.normal(kx, (B, S, D), jnp.float32)
    params = init_params(kp, D)
    weights = prepare_weights(params)   # fused bf16 weights, built once and reused

    out = jax.block_until_ready(encoder_forward(x, weights, n_heads))
    ref = jax.block_until_ready(encoder_ref(x, params, n_heads))

    assert out.shape == (B, S, D)
    # bf16 MXU inputs + approx reciprocal => slightly looser tolerance vs f32 ref.
    assert jnp.allclose(out, ref, rtol=2e-2, atol=2e-2), (
        f"max abs diff {float(jnp.max(jnp.abs(out - ref)))}")
    print("KERNEL_OK")
</pallas_src>

<mosaic_0001>
module attributes {stable_mosaic.version = 11 : i64} {
  func.func @encoder_kernel(%arg0: i32, %arg1: i32, %arg2: memref<16x32xf32, #tpu.memory_space<vmem>>, %arg3: memref<32x96xbf16, #tpu.memory_space<any>>, %arg4: memref<32x32xbf16, #tpu.memory_space<any>>, %arg5: memref<32x256xbf16, #tpu.memory_space<any>>, %arg6: memref<128x32xbf16, #tpu.memory_space<any>>, %arg7: memref<1x32xf32, #tpu.memory_space<vmem>>, %arg8: memref<1x32xf32, #tpu.memory_space<vmem>>, %arg9: memref<16x32xf32, #tpu.memory_space<vmem>>, %arg10: memref<32x96xbf16, #tpu.memory_space<vmem>>, %arg11: memref<32x32xbf16, #tpu.memory_space<vmem>>, %arg12: memref<32x256xbf16, #tpu.memory_space<vmem>>, %arg13: memref<128x32xbf16, #tpu.memory_space<vmem>>, %arg14: memref<16x32xf32, #tpu.memory_space<vmem>>, %arg15: memref<4x!tpu.dma_semaphore, #tpu.memory_space<semaphore_mem>>) attributes {dimension_semantics = [#tpu.dimension_semantics<parallel>, #tpu.dimension_semantics<arbitrary>], iteration_bounds = array<i64: 1, 1>, scalar_prefetch = 0 : i64, scratch_operands = 6 : i64, tpu.core_type = #tpu.core_type<tc>, window_params = [{transform_indices = @transform_0, window_bounds = array<i64: 16, 32>}, {}, {}, {}, {}, {pipeline_mode = #tpu.pipeline_mode<synchronous>, transform_indices = @transform_5, window_bounds = array<i64: 1, 32>}, {pipeline_mode = #tpu.pipeline_mode<synchronous>, transform_indices = @transform_6, window_bounds = array<i64: 1, 32>}, {transform_indices = @transform_7, window_bounds = array<i64: 16, 32>}]} {
    %c0_i32 = arith.constant 0 : i32
    %0 = arith.cmpi eq, %arg1, %c0_i32 : i32
    %1 = arith.extui %0 : i1 to i32
    %c0_i32_0 = arith.constant 0 : i32
    %2 = arith.cmpi ne, %1, %c0_i32_0 : i32
    scf.if %2 {
      %c0_i32_122 = arith.constant 0 : i32
      %352 = tpu.memref_slice %arg15[%c0_i32_122] : memref<4x!tpu.dma_semaphore, #tpu.memory_space<semaphore_mem>> -> memref<1x!tpu.dma_semaphore, #tpu.memory_space<semaphore_mem>>
      %353 = tpu.memref_squeeze %352 : memref<1x!tpu.dma_semaphore, #tpu.memory_space<semaphore_mem>> -> memref<!tpu.dma_semaphore, #tpu.memory_space<semaphore_mem>>
      tpu.enqueue_dma source(%arg3 : memref<32x96xbf16, #tpu.memory_space<any>>) target(%arg10 : memref<32x96xbf16, #tpu.memory_space<vmem>>) target_semaphore(%353 : memref<!tpu.dma_semaphore, #tpu.memory_space<semaphore_mem>>)
      %c1_i32 = arith.constant 1 : i32
      %354 = tpu.memref_slice %arg15[%c1_i32] : memref<4x!tpu.dma_semaphore, #tpu.memory_space<semaphore_mem>> -> memref<1x!tpu.dma_semaphore, #tpu.memory_space<semaphore_mem>>
      %355 = tpu.memref_squeeze %354 : memref<1x!tpu.dma_semaphore, #tpu.memory_space<semaphore_mem>> -> memref<!tpu.dma_semaphore, #tpu.memory_space<semaphore_mem>>
      tpu.enqueue_dma source(%arg4 : memref<32x32xbf16, #tpu.memory_space<any>>) target(%arg11 : memref<32x32xbf16, #tpu.memory_space<vmem>>) target_semaphore(%355 : memref<!tpu.dma_semaphore, #tpu.memory_space<semaphore_mem>>)
      %c2_i32 = arith.constant 2 : i32
      %356 = tpu.memref_slice %arg15[%c2_i32] : memref<4x!tpu.dma_semaphore, #tpu.memory_space<semaphore_mem>> -> memref<1x!tpu.dma_semaphore, #tpu.memory_space<semaphore_mem>>
      %357 = tpu.memref_squeeze %356 : memref<1x!tpu.dma_semaphore, #tpu.memory_space<semaphore_mem>> -> memref<!tpu.dma_semaphore, #tpu.memory_space<semaphore_mem>>
      tpu.enqueue_dma source(%arg5 : memref<32x256xbf16, #tpu.memory_space<any>>) target(%arg12 : memref<32x256xbf16, #tpu.memory_space<vmem>>) target_semaphore(%357 : memref<!tpu.dma_semaphore, #tpu.memory_space<semaphore_mem>>)
      %c3_i32 = arith.constant 3 : i32
      %358 = tpu.memref_slice %arg15[%c3_i32] : memref<4x!tpu.dma_semaphore, #tpu.memory_space<semaphore_mem>> -> memref<1x!tpu.dma_semaphore, #tpu.memory_space<semaphore_mem>>
      %359 = tpu.memref_squeeze %358 : memref<1x!tpu.dma_semaphore, #tpu.memory_space<semaphore_mem>> -> memref<!tpu.dma_semaphore, #tpu.memory_space<semaphore_mem>>
      tpu.enqueue_dma source(%arg6 : memref<128x32xbf16, #tpu.memory_space<any>>) target(%arg13 : memref<128x32xbf16, #tpu.memory_space<vmem>>) target_semaphore(%359 : memref<!tpu.dma_semaphore, #tpu.memory_space<semaphore_mem>>)
    } else {
    }
    %c0 = arith.constant 0 : index
    %c0_1 = arith.constant 0 : index
    %3 = vector.load %arg2[%c0, %c0_1] : memref<16x32xf32, #tpu.memory_space<vmem>>, vector<16x32xf32>
    %c0_2 = arith.constant 0 : index
    %c0_3 = arith.constant 0 : index
    %4 = vector.load %arg7[%c0_2, %c0_3] : memref<1x32xf32, #tpu.memory_space<vmem>>, vector<1x32xf32>
    %5 = arith.mulf %3, %3 : vector<16x32xf32>
    %cst = arith.constant dense<0.000000e+00> : vector<16xf32>
    %6 = vector.multi_reduction <add>, %5, %cst [1] : vector<16x32xf32> to vector<16xf32>
    %7 = vector.shape_cast %6 : vector<16xf32> to vector<16x1xf32>
    %cst_4 = arith.constant 3.200000e+01 : f32
    %8 = vector.broadcast %cst_4 : f32 to vector<16x1xf32>
    %9 = arith.divf %7, %8 : vector<16x1xf32>
    %cst_5 = arith.constant 9.99999974E-6 : f32
    %10 = vector.broadcast %cst_5 : f32 to vector<16x1xf32>
    %11 = arith.addf %9, %10 : vector<16x1xf32>
    %12 = math.rsqrt %11 : vector<16x1xf32>
    %13 = vector.broadcast %12 : vector<16x1xf32> to vector<16x32xf32>
    %14 = arith.mulf %3, %13 : vector<16x32xf32>
    %15 = vector.broadcast %4 : vector<1x32xf32> to vector<16x32xf32>
    %16 = arith.mulf %15, %14 : vector<16x32xf32>
    %17 = arith.truncf %16 : vector<16x32xf32> to vector<16x32xbf16>
    %18 = arith.extui %0 : i1 to i32
    %c0_i32_6 = arith.constant 0 : i32
    %19 = arith.cmpi ne, %18, %c0_i32_6 : i32
    scf.if %19 {
      %c0_i32_122 = arith.constant 0 : i32
      %352 = tpu.memref_slice %arg15[%c0_i32_122] : memref<4x!tpu.dma_semaphore, #tpu.memory_space<semaphore_mem>> -> memref<1x!tpu.dma_semaphore, #tpu.memory_space<semaphore_mem>>
      %353 = tpu.memref_squeeze %352 : memref<1x!tpu.dma_semaphore, #tpu.memory_space<semaphore_mem>> -> memref<!tpu.dma_semaphore, #tpu.memory_space<semaphore_mem>>
      tpu.wait_dma2 semaphore(%353 : memref<!tpu.dma_semaphore, #tpu.memory_space<semaphore_mem>>) src(%arg3 : memref<32x96xbf16, #tpu.memory_space<any>>) dst(%arg10 : memref<32x96xbf16, #tpu.memory_space<vmem>>)
    } else {
    }
    %c0_7 = arith.constant 0 : index
    %c0_8 = arith.constant 0 : index
    %20 = vector.load %arg10[%c0_7, %c0_8] : memref<32x96xbf16, #tpu.memory_space<vmem>>, vector<32x96xbf16>
    %cst_9 = arith.constant dense<0.000000e+00> : vector<16x96xf32>
    %21 = tpu.matmul %17, %20, %cst_9 {dimension_numbers = #tpu.dot_dimension_numbers<[1], [0], [0], [1], [0, 0, 1, 1], [], []>} : vector<16x32xbf16>, vector<32x96xbf16>, vector<16x96xf32> -> vector<16x96xf32>
    %22 = arith.extui %0 : i1 to i32
    %c0_i32_10 = arith.constant 0 : i32
    %23 = arith.cmpi ne, %22, %c0_i32_10 : i32
    scf.if %23 {
      %c1_i32 = arith.constant 1 : i32
      %352 = tpu.memref_slice %arg15[%c1_i32] : memref<4x!tpu.dma_semaphore, #tpu.memory_space<semaphore_mem>> -> memref<1x!tpu.dma_semaphore, #tpu.memory_space<semaphore_mem>>
      %353 = tpu.memref_squeeze %352 : memref<1x!tpu.dma_semaphore, #tpu.memory_space<semaphore_mem>> -> memref<!tpu.dma_semaphore, #tpu.memory_space<semaphore_mem>>
      tpu.wait_dma2 semaphore(%353 : memref<!tpu.dma_semaphore, #tpu.memory_space<semaphore_mem>>) src(%arg4 : memref<32x32xbf16, #tpu.memory_space<any>>) dst(%arg11 : memref<32x32xbf16, #tpu.memory_space<vmem>>)
    } else {
    }
    %cst_11 = arith.constant 0.000000e+00 : f32
    %24 = vector.broadcast %cst_11 : f32 to vector<8x32xf32>
    %25 = vector.extract_strided_slice %21 {offsets = [0, 0], sizes = [8, 8], strides = [1, 1]} : vector<16x96xf32> to vector<8x8xf32>
    %cst_12 = arith.constant 0.353553385 : f32
    %26 = vector.broadcast %cst_12 : f32 to vector<8x8xf32>
    %27 = arith.mulf %25, %26 : vector<8x8xf32>
    %28 = arith.truncf %27 : vector<8x8xf32> to vector<8x8xbf16>
    %cst_13 = arith.constant 0xFF800000 : f32
    %29 = vector.broadcast %cst_13 : f32 to vector<8x1xf32>
    %cst_14 = arith.constant 0.000000e+00 : f32
    %30 = vector.broadcast %cst_14 : f32 to vector<8x1xf32>
    %cst_15 = arith.constant 0.000000e+00 : f32
    %31 = vector.broadcast %cst_15 : f32 to vector<8x8xf32>
    %32 = vector.extract_strided_slice %21 {offsets = [0, 32], sizes = [8, 8], strides = [1, 1]} : vector<16x96xf32> to vector<8x8xf32>
    %33 = arith.truncf %32 : vector<8x8xf32> to vector<8x8xbf16>
    %34 = vector.extract_strided_slice %21 {offsets = [0, 64], sizes = [8, 8], strides = [1, 1]} : vector<16x96xf32> to vector<8x8xf32>
    %35 = arith.truncf %34 : vector<8x8xf32> to vector<8x8xbf16>
    %cst_16 = arith.constant dense<0.000000e+00> : vector<8x8xf32>
    %36 = tpu.matmul %28, %33, %cst_16 {dimension_numbers = #tpu.dot_dimension_numbers<[1], [1], [0], [0], [0, 0, 1, 0], [], []>} : vector<8x8xbf16>, vector<8x8xbf16>, vector<8x8xf32> -> vector<8x8xf32>
    %cst_17 = arith.constant dense<0xFF800000> : vector<8xf32>
    %37 = vector.multi_reduction <maximumf>, %36, %cst_17 [1] : vector<8x8xf32> to vector<8xf32>
    %38 = vector.shape_cast %37 : vector<8xf32> to vector<8x1xf32>
    %39 = arith.maximumf %29, %38 : vector<8x1xf32>
    %40 = arith.subf %29, %39 : vector<8x1xf32>
    %41 = math.exp %40 : vector<8x1xf32>
    %42 = vector.broadcast %39 : vector<8x1xf32> to vector<8x8xf32>
    %43 = arith.subf %36, %42 : vector<8x8xf32>
    %44 = math.exp %43 : vector<8x8xf32>
    %45 = arith.mulf %41, %30 : vector<8x1xf32>
    %cst_18 = arith.constant dense<0.000000e+00> : vector<8xf32>
    %46 = vector.multi_reduction <add>, %44, %cst_18 [1] : vector<8x8xf32> to vector<8xf32>
    %47 = vector.shape_cast %46 : vector<8xf32> to vector<8x1xf32>
    %48 = arith.addf %45, %47 : vector<8x1xf32>
    %49 = vector.broadcast %41 : vector<8x1xf32> to vector<8x8xf32>
    %50 = arith.mulf %49, %31 : vector<8x8xf32>
    %51 = arith.truncf %44 : vector<8x8xf32> to vector<8x8xbf16>
    %cst_19 = arith.constant dense<0.000000e+00> : vector<8x8xf32>
    %52 = tpu.matmul %51, %35, %cst_19 {dimension_numbers = #tpu.dot_dimension_numbers<[1], [0], [0], [1], [0, 0, 1, 1], [], []>} : vector<8x8xbf16>, vector<8x8xbf16>, vector<8x8xf32> -> vector<8x8xf32>
    %53 = arith.addf %50, %52 : vector<8x8xf32>
    %54 = tpu.reciprocal %48 {approx = true} : vector<8x1xf32> -> vector<8x1xf32>
    %55 = vector.broadcast %54 : vector<8x1xf32> to vector<8x8xf32>
    %56 = arith.mulf %53, %55 : vector<8x8xf32>
    %57 = arith.truncf %56 : vector<8x8xf32> to vector<8x8xbf16>
    %c0_20 = arith.constant 0 : index
    %c0_21 = arith.constant 0 : index
    %58 = vector.load %arg11[%c0_20, %c0_21] : memref<32x32xbf16, #tpu.memory_space<vmem>>, vector<8x32xbf16>
    %cst_22 = arith.constant dense<0.000000e+00> : vector<8x32xf32>
    %59 = tpu.matmul %57, %58, %cst_22 {dimension_numbers = #tpu.dot_dimension_numbers<[1], [0], [0], [1], [0, 0, 1, 1], [], []>} : vector<8x8xbf16>, vector<8x32xbf16>, vector<8x32xf32> -> vector<8x32xf32>
    %60 = arith.addf %24, %59 : vector<8x32xf32>
    %61 = vector.extract_strided_slice %21 {offsets = [0, 8], sizes = [8, 8], strides = [1, 1]} : vector<16x96xf32> to vector<8x8xf32>
    %cst_23 = arith.constant 0.353553385 : f32
    %62 = vector.broadcast %cst_23 : f32 to vector<8x8xf32>
    %63 = arith.mulf %61, %62 : vector<8x8xf32>
    %64 = arith.truncf %63 : vector<8x8xf32> to vector<8x8xbf16>
    %cst_24 = arith.constant 0xFF800000 : f32
    %65 = vector.broadcast %cst_24 : f32 to vector<8x1xf32>
    %cst_25 = arith.constant 0.000000e+00 : f32
    %66 = vector.broadcast %cst_25 : f32 to vector<8x1xf32>
    %cst_26 = arith.constant 0.000000e+00 : f32
    %67 = vector.broadcast %cst_26 : f32 to vector<8x8xf32>
    %68 = vector.extract_strided_slice %21 {offsets = [0, 40], sizes = [8, 8], strides = [1, 1]} : vector<16x96xf32> to vector<8x8xf32>
    %69 = arith.truncf %68 : vector<8x8xf32> to vector<8x8xbf16>
    %70 = vector.extract_strided_slice %21 {offsets = [0, 72], sizes = [8, 8], strides = [1, 1]} : vector<16x96xf32> to vector<8x8xf32>
    %71 = arith.truncf %70 : vector<8x8xf32> to vector<8x8xbf16>
    %cst_27 = arith.constant dense<0.000000e+00> : vector<8x8xf32>
    %72 = tpu.matmul %64, %69, %cst_27 {dimension_numbers = #tpu.dot_dimension_numbers<[1], [1], [0], [0], [0, 0, 1, 0], [], []>} : vector<8x8xbf16>, vector<8x8xbf16>, vector<8x8xf32> -> vector<8x8xf32>
    %cst_28 = arith.constant dense<0xFF800000> : vector<8xf32>
    %73 = vector.multi_reduction <maximumf>, %72, %cst_28 [1] : vector<8x8xf32> to vector<8xf32>
    %74 = vector.shape_cast %73 : vector<8xf32> to vector<8x1xf32>
    %75 = arith.maximumf %65, %74 : vector<8x1xf32>
    %76 = arith.subf %65, %75 : vector<8x1xf32>
    %77 = math.exp %76 : vector<8x1xf32>
    %78 = vector.broadcast %75 : vector<8x1xf32> to vector<8x8xf32>
    %79 = arith.subf %72, %78 : vector<8x8xf32>
    %80 = math.exp %79 : vector<8x8xf32>
    %81 = arith.mulf %77, %66 : vector<8x1xf32>
    %cst_29 = arith.constant dense<0.000000e+00> : vector<8xf32>
    %82 = vector.multi_reduction <add>, %80, %cst_29 [1] : vector<8x8xf32> to vector<8xf32>
    %83 = vector.shape_cast %82 : vector<8xf32> to vector<8x1xf32>
    %84 = arith.addf %81, %83 : vector<8x1xf32>
    %85 = vector.broadcast %77 : vector<8x1xf32> to vector<8x8xf32>
    %86 = arith.mulf %85, %67 : vector<8x8xf32>
    %87 = arith.truncf %80 : vector<8x8xf32> to vector<8x8xbf16>
    %cst_30 = arith.constant dense<0.000000e+00> : vector<8x8xf32>
    %88 = tpu.matmul %87, %71, %cst_30 {dimension_numbers = #tpu.dot_dimension_numbers<[1], [0], [0], [1], [0, 0, 1, 1], [], []>} : vector<8x8xbf16>, vector<8x8xbf16>, vector<8x8xf32> -> vector<8x8xf32>
    %89 = arith.addf %86, %88 : vector<8x8xf32>
    %90 = tpu.reciprocal %84 {approx = true} : vector<8x1xf32> -> vector<8x1xf32>
    %91 = vector.broadcast %90 : vector<8x1xf32> to vector<8x8xf32>
    %92 = arith.mulf %89, %91 : vector<8x8xf32>
    %93 = arith.truncf %92 : vector<8x8xf32> to vector<8x8xbf16>
    %c8 = arith.constant 8 : index
    %c0_31 = arith.constant 0 : index
    %94 = vector.load %arg11[%c8, %c0_31] : memref<32x32xbf16, #tpu.memory_space<vmem>>, vector<8x32xbf16>
    %cst_32 = arith.constant dense<0.000000e+00> : vector<8x32xf32>
    %95 = tpu.matmul %93, %94, %cst_32 {dimension_numbers = #tpu.dot_dimension_numbers<[1], [0], [0], [1], [0, 0, 1, 1], [], []>} : vector<8x8xbf16>, vector<8x32xbf16>, vector<8x32xf32> -> vector<8x32xf32>
    %96 = arith.addf %60, %95 : vector<8x32xf32>
    %97 = vector.extract_strided_slice %21 {offsets = [0, 16], sizes = [8, 8], strides = [1, 1]} : vector<16x96xf32> to vector<8x8xf32>
    %cst_33 = arith.constant 0.353553385 : f32
    %98 = vector.broadcast %cst_33 : f32 to vector<8x8xf32>
    %99 = arith.mulf %97, %98 : vector<8x8xf32>
    %100 = arith.truncf %99 : vector<8x8xf32> to vector<8x8xbf16>
    %cst_34 = arith.constant 0xFF800000 : f32
    %101 = vector.broadcast %cst_34 : f32 to vector<8x1xf32>
    %cst_35 = arith.constant 0.000000e+00 : f32
    %102 = vector.broadcast %cst_35 : f32 to vector<8x1xf32>
    %cst_36 = arith.constant 0.000000e+00 : f32
    %103 = vector.broadcast %cst_36 : f32 to vector<8x8xf32>
    %104 = vector.extract_strided_slice %21 {offsets = [0, 48], sizes = [8, 8], strides = [1, 1]} : vector<16x96xf32> to vector<8x8xf32>
    %105 = arith.truncf %104 : vector<8x8xf32> to vector<8x8xbf16>
    %106 = vector.extract_strided_slice %21 {offsets = [0, 80], sizes = [8, 8], strides = [1, 1]} : vector<16x96xf32> to vector<8x8xf32>
    %107 = arith.truncf %106 : vector<8x8xf32> to vector<8x8xbf16>
    %cst_37 = arith.constant dense<0.000000e+00> : vector<8x8xf32>
    %108 = tpu.matmul %100, %105, %cst_37 {dimension_numbers = #tpu.dot_dimension_numbers<[1], [1], [0], [0], [0, 0, 1, 0], [], []>} : vector<8x8xbf16>, vector<8x8xbf16>, vector<8x8xf32> -> vector<8x8xf32>
    %cst_38 = arith.constant dense<0xFF800000> : vector<8xf32>
    %109 = vector.multi_reduction <maximumf>, %108, %cst_38 [1] : vector<8x8xf32> to vector<8xf32>
    %110 = vector.shape_cast %109 : vector<8xf32> to vector<8x1xf32>
    %111 = arith.maximumf %101, %110 : vector<8x1xf32>
    %112 = arith.subf %101, %111 : vector<8x1xf32>
    %113 = math.exp %112 : vector<8x1xf32>
    %114 = vector.broadcast %111 : vector<8x1xf32> to vector<8x8xf32>
    %115 = arith.subf %108, %114 : vector<8x8xf32>
    %116 = math.exp %115 : vector<8x8xf32>
    %117 = arith.mulf %113, %102 : vector<8x1xf32>
    %cst_39 = arith.constant dense<0.000000e+00> : vector<8xf32>
    %118 = vector.multi_reduction <add>, %116, %cst_39 [1] : vector<8x8xf32> to vector<8xf32>
    %119 = vector.shape_cast %118 : vector<8xf32> to vector<8x1xf32>
    %120 = arith.addf %117, %119 : vector<8x1xf32>
    %121 = vector.broadcast %113 : vector<8x1xf32> to vector<8x8xf32>
    %122 = arith.mulf %121, %103 : vector<8x8xf32>
    %123 = arith.truncf %116 : vector<8x8xf32> to vector<8x8xbf16>
    %cst_40 = arith.constant dense<0.000000e+00> : vector<8x8xf32>
    %124 = tpu.matmul %123, %107, %cst_40 {dimension_numbers = #tpu.dot_dimension_numbers<[1], [0], [0], [1], [0, 0, 1, 1], [], []>} : vector<8x8xbf16>, vector<8x8xbf16>, vector<8x8xf32> -> vector<8x8xf32>
    %125 = arith.addf %122, %124 : vector<8x8xf32>
    %126 = tpu.reciprocal %120 {approx = true} : vector<8x1xf32> -> vector<8x1xf32>
    %127 = vector.broadcast %126 : vector<8x1xf32> to vector<8x8xf32>
    %128 = arith.mulf %125, %127 : vector<8x8xf32>
    %129 = arith.truncf %128 : vector<8x8xf32> to vector<8x8xbf16>
    %c16 = arith.constant 16 : index
    %c0_41 = arith.constant 0 : index
    %130 = vector.load %arg11[%c16, %c0_41] : memref<32x32xbf16, #tpu.memory_space<vmem>>, vector<8x32xbf16>
    %cst_42 = arith.constant dense<0.000000e+00> : vector<8x32xf32>
    %131 = tpu.matmul %129, %130, %cst_42 {dimension_numbers = #tpu.dot_dimension_numbers<[1], [0], [0], [1], [0, 0, 1, 1], [], []>} : vector<8x8xbf16>, vector<8x32xbf16>, vector<8x32xf32> -> vector<8x32xf32>
    %132 = arith.addf %96, %131 : vector<8x32xf32>
    %133 = vector.extract_strided_slice %21 {offsets = [0, 24], sizes = [8, 8], strides = [1, 1]} : vector<16x96xf32> to vector<8x8xf32>
    %cst_43 = arith.constant 0.353553385 : f32
    %134 = vector.broadcast %cst_43 : f32 to vector<8x8xf32>
    %135 = arith.mulf %133, %134 : vector<8x8xf32>
    %136 = arith.truncf %135 : vector<8x8xf32> to vector<8x8xbf16>
    %cst_44 = arith.constant 0xFF800000 : f32
    %137 = vector.broadcast %cst_44 : f32 to vector<8x1xf32>
    %cst_45 = arith.constant 0.000000e+00 : f32
    %138 = vector.broadcast %cst_45 : f32 to vector<8x1xf32>
    %cst_46 = arith.constant 0.000000e+00 : f32
    %139 = vector.broadcast %cst_46 : f32 to vector<8x8xf32>
    %140 = vector.extract_strided_slice %21 {offsets = [0, 56], sizes = [8, 8], strides = [1, 1]} : vector<16x96xf32> to vector<8x8xf32>
    %141 = arith.truncf %140 : vector<8x8xf32> to vector<8x8xbf16>
    %142 = vector.extract_strided_slice %21 {offsets = [0, 88], sizes = [8, 8], strides = [1, 1]} : vector<16x96xf32> to vector<8x8xf32>
    %143 = arith.truncf %142 : vector<8x8xf32> to vector<8x8xbf16>
    %cst_47 = arith.constant dense<0.000000e+00> : vector<8x8xf32>
    %144 = tpu.matmul %136, %141, %cst_47 {dimension_numbers = #tpu.dot_dimension_numbers<[1], [1], [0], [0], [0, 0, 1, 0], [], []>} : vector<8x8xbf16>, vector<8x8xbf16>, vector<8x8xf32> -> vector<8x8xf32>
    %cst_48 = arith.constant dense<0xFF800000> : vector<8xf32>
    %145 = vector.multi_reduction <maximumf>, %144, %cst_48 [1] : vector<8x8xf32> to vector<8xf32>
    %146 = vector.shape_cast %145 : vector<8xf32> to vector<8x1xf32>
    %147 = arith.maximumf %137, %146 : vector<8x1xf32>
    %148 = arith.subf %137, %147 : vector<8x1xf32>
    %149 = math.exp %148 : vector<8x1xf32>
    %150 = vector.broadcast %147 : vector<8x1xf32> to vector<8x8xf32>
    %151 = arith.subf %144, %150 : vector<8x8xf32>
    %152 = math.exp %151 : vector<8x8xf32>
    %153 = arith.mulf %149, %138 : vector<8x1xf32>
    %cst_49 = arith.constant dense<0.000000e+00> : vector<8xf32>
    %154 = vector.multi_reduction <add>, %152, %cst_49 [1] : vector<8x8xf32> to vector<8xf32>
    %155 = vector.shape_cast %154 : vector<8xf32> to vector<8x1xf32>
    %156 = arith.addf %153, %155 : vector<8x1xf32>
    %157 = vector.broadcast %149 : vector<8x1xf32> to vector<8x8xf32>
    %158 = arith.mulf %157, %139 : vector<8x8xf32>
    %159 = arith.truncf %152 : vector<8x8xf32> to vector<8x8xbf16>
    %cst_50 = arith.constant dense<0.000000e+00> : vector<8x8xf32>
    %160 = tpu.matmul %159, %143, %cst_50 {dimension_numbers = #tpu.dot_dimension_numbers<[1], [0], [0], [1], [0, 0, 1, 1], [], []>} : vector<8x8xbf16>, vector<8x8xbf16>, vector<8x8xf32> -> vector<8x8xf32>
    %161 = arith.addf %158, %160 : vector<8x8xf32>
    %162 = tpu.reciprocal %156 {approx = true} : vector<8x1xf32> -> vector<8x1xf32>
    %163 = vector.broadcast %162 : vector<8x1xf32> to vector<8x8xf32>
    %164 = arith.mulf %161, %163 : vector<8x8xf32>
    %165 = arith.truncf %164 : vector<8x8xf32> to vector<8x8xbf16>
    %c24 = arith.constant 24 : index
    %c0_51 = arith.constant 0 : index
    %166 = vector.load %arg11[%c24, %c0_51] : memref<32x32xbf16, #tpu.memory_space<vmem>>, vector<8x32xbf16>
    %cst_52 = arith.constant dense<0.000000e+00> : vector<8x32xf32>
    %167 = tpu.matmul %165, %166, %cst_52 {dimension_numbers = #tpu.dot_dimension_numbers<[1], [0], [0], [1], [0, 0, 1, 1], [], []>} : vector<8x8xbf16>, vector<8x32xbf16>, vector<8x32xf32> -> vector<8x32xf32>
    %168 = arith.addf %132, %167 : vector<8x32xf32>
    %c0_53 = arith.constant 0 : index
    %c0_54 = arith.constant 0 : index
    %169 = vector.load %arg14[%c0_53, %c0_54] : memref<16x32xf32, #tpu.memory_space<vmem>>, vector<8x32xf32>
    tpu.vector_store %arg14[%c0_53, %c0_54], %168 {strides = array<i32>} : memref<16x32xf32, #tpu.memory_space<vmem>>, vector<8x32xf32>,
    %cst_55 = arith.constant 0.000000e+00 : f32
    %170 = vector.broadcast %cst_55 : f32 to vector<8x32xf32>
    %171 = vector.extract_strided_slice %21 {offsets = [8, 0], sizes = [8, 8], strides = [1, 1]} : vector<16x96xf32> to vector<8x8xf32>
    %cst_56 = arith.constant 0.353553385 : f32
    %172 = vector.broadcast %cst_56 : f32 to vector<8x8xf32>
    %173 = arith.mulf %171, %172 : vector<8x8xf32>
    %174 = arith.truncf %173 : vector<8x8xf32> to vector<8x8xbf16>
    %cst_57 = arith.constant 0xFF800000 : f32
    %175 = vector.broadcast %cst_57 : f32 to vector<8x1xf32>
    %cst_58 = arith.constant 0.000000e+00 : f32
    %176 = vector.broadcast %cst_58 : f32 to vector<8x1xf32>
    %cst_59 = arith.constant 0.000000e+00 : f32
    %177 = vector.broadcast %cst_59 : f32 to vector<8x8xf32>
    %178 = vector.extract_strided_slice %21 {offsets = [8, 32], sizes = [8, 8], strides = [1, 1]} : vector<16x96xf32> to vector<8x8xf32>
    %179 = arith.truncf %178 : vector<8x8xf32> to vector<8x8xbf16>
    %180 = vector.extract_strided_slice %21 {offsets = [8, 64], sizes = [8, 8], strides = [1, 1]} : vector<16x96xf32> to vector<8x8xf32>
    %181 = arith.truncf %180 : vector<8x8xf32> to vector<8x8xbf16>
    %cst_60 = arith.constant dense<0.000000e+00> : vector<8x8xf32>
    %182 = tpu.matmul %174, %179, %cst_60 {dimension_numbers = #tpu.dot_dimension_numbers<[1], [1], [0], [0], [0, 0, 1, 0], [], []>} : vector<8x8xbf16>, vector<8x8xbf16>, vector<8x8xf32> -> vector<8x8xf32>
    %cst_61 = arith.constant dense<0xFF800000> : vector<8xf32>
    %183 = vector.multi_reduction <maximumf>, %182, %cst_61 [1] : vector<8x8xf32> to vector<8xf32>
    %184 = vector.shape_cast %183 : vector<8xf32> to vector<8x1xf32>
    %185 = arith.maximumf %175, %184 : vector<8x1xf32>
    %186 = arith.subf %175, %185 : vector<8x1xf32>
    %187 = math.exp %186 : vector<8x1xf32>
    %188 = vector.broadcast %185 : vector<8x1xf32> to vector<8x8xf32>
    %189 = arith.subf %182, %188 : vector<8x8xf32>
    %190 = math.exp %189 : vector<8x8xf32>
    %191 = arith.mulf %187, %176 : vector<8x1xf32>
    %cst_62 = arith.constant dense<0.000000e+00> : vector<8xf32>
    %192 = vector.multi_reduction <add>, %190, %cst_62 [1] : vector<8x8xf32> to vector<8xf32>
    %193 = vector.shape_cast %192 : vector<8xf32> to vector<8x1xf32>
    %194 = arith.addf %191, %193 : vector<8x1xf32>
    %195 = vector.broadcast %187 : vector<8x1xf32> to vector<8x8xf32>
    %196 = arith.mulf %195, %177 : vector<8x8xf32>
    %197 = arith.truncf %190 : vector<8x8xf32> to vector<8x8xbf16>
    %cst_63 = arith.constant dense<0.000000e+00> : vector<8x8xf32>
    %198 = tpu.matmul %197, %181, %cst_63 {dimension_numbers = #tpu.dot_dimension_numbers<[1], [0], [0], [1], [0, 0, 1, 1], [], []>} : vector<8x8xbf16>, vector<8x8xbf16>, vector<8x8xf32> -> vector<8x8xf32>
    %199 = arith.addf %196, %198 : vector<8x8xf32>
    %200 = tpu.reciprocal %194 {approx = true} : vector<8x1xf32> -> vector<8x1xf32>
    %201 = vector.broadcast %200 : vector<8x1xf32> to vector<8x8xf32>
    %202 = arith.mulf %199, %201 : vector<8x8xf32>
    %203 = arith.truncf %202 : vector<8x8xf32> to vector<8x8xbf16>
    %c0_64 = arith.constant 0 : index
    %c0_65 = arith.constant 0 : index
    %204 = vector.load %arg11[%c0_64, %c0_65] : memref<32x32xbf16, #tpu.memory_space<vmem>>, vector<8x32xbf16>
    %cst_66 = arith.constant dense<0.000000e+00> : vector<8x32xf32>
    %205 = tpu.matmul %203, %204, %cst_66 {dimension_numbers = #tpu.dot_dimension_numbers<[1], [0], [0], [1], [0, 0, 1, 1], [], []>} : vector<8x8xbf16>, vector<8x32xbf16>, vector<8x32xf32> -> vector<8x32xf32>
    %206 = arith.addf %170, %205 : vector<8x32xf32>
    %207 = vector.extract_strided_slice %21 {offsets = [8, 8], sizes = [8, 8], strides = [1, 1]} : vector<16x96xf32> to vector<8x8xf32>
    %cst_67 = arith.constant 0.353553385 : f32
    %208 = vector.broadcast %cst_67 : f32 to vector<8x8xf32>
    %209 = arith.mulf %207, %208 : vector<8x8xf32>
    %210 = arith.truncf %209 : vector<8x8xf32> to vector<8x8xbf16>
    %cst_68 = arith.constant 0xFF800000 : f32
    %211 = vector.broadcast %cst_68 : f32 to vector<8x1xf32>
    %cst_69 = arith.constant 0.000000e+00 : f32
    %212 = vector.broadcast %cst_69 : f32 to vector<8x1xf32>
    %cst_70 = arith.constant 0.000000e+00 : f32
    %213 = vector.broadcast %cst_70 : f32 to vector<8x8xf32>
    %214 = vector.extract_strided_slice %21 {offsets = [8, 40], sizes = [8, 8], strides = [1, 1]} : vector<16x96xf32> to vector<8x8xf32>
    %215 = arith.truncf %214 : vector<8x8xf32> to vector<8x8xbf16>
    %216 = vector.extract_strided_slice %21 {offsets = [8, 72], sizes = [8, 8], strides = [1, 1]} : vector<16x96xf32> to vector<8x8xf32>
    %217 = arith.truncf %216 : vector<8x8xf32> to vector<8x8xbf16>
    %cst_71 = arith.constant dense<0.000000e+00> : vector<8x8xf32>
    %218 = tpu.matmul %210, %215, %cst_71 {dimension_numbers = #tpu.dot_dimension_numbers<[1], [1], [0], [0], [0, 0, 1, 0], [], []>} : vector<8x8xbf16>, vector<8x8xbf16>, vector<8x8xf32> -> vector<8x8xf32>
    %cst_72 = arith.constant dense<0xFF800000> : vector<8xf32>
    %219 = vector.multi_reduction <maximumf>, %218, %cst_72 [1] : vector<8x8xf32> to vector<8xf32>
    %220 = vector.shape_cast %219 : vector<8xf32> to vector<8x1xf32>
    %221 = arith.maximumf %211, %220 : vector<8x1xf32>
    %222 = arith.subf %211, %221 : vector<8x1xf32>
    %223 = math.exp %222 : vector<8x1xf32>
    %224 = vector.broadcast %221 : vector<8x1xf32> to vector<8x8xf32>
    %225 = arith.subf %218, %224 : vector<8x8xf32>
    %226 = math.exp %225 : vector<8x8xf32>
    %227 = arith.mulf %223, %212 : vector<8x1xf32>
    %cst_73 = arith.constant dense<0.000000e+00> : vector<8xf32>
    %228 = vector.multi_reduction <add>, %226, %cst_73 [1] : vector<8x8xf32> to vector<8xf32>
    %229 = vector.shape_cast %228 : vector<8xf32> to vector<8x1xf32>
    %230 = arith.addf %227, %229 : vector<8x1xf32>
    %231 = vector.broadcast %223 : vector<8x1xf32> to vector<8x8xf32>
    %232 = arith.mulf %231, %213 : vector<8x8xf32>
    %233 = arith.truncf %226 : vector<8x8xf32> to vector<8x8xbf16>
    %cst_74 = arith.constant dense<0.000000e+00> : vector<8x8xf32>
    %234 = tpu.matmul %233, %217, %cst_74 {dimension_numbers = #tpu.dot_dimension_numbers<[1], [0], [0], [1], [0, 0, 1, 1], [], []>} : vector<8x8xbf16>, vector<8x8xbf16>, vector<8x8xf32> -> vector<8x8xf32>
    %235 = arith.addf %232, %234 : vector<8x8xf32>
    %236 = tpu.reciprocal %230 {approx = true} : vector<8x1xf32> -> vector<8x1xf32>
    %237 = vector.broadcast %236 : vector<8x1xf32> to vector<8x8xf32>
    %238 = arith.mulf %235, %237 : vector<8x8xf32>
    %239 = arith.truncf %238 : vector<8x8xf32> to vector<8x8xbf16>
    %c8_75 = arith.constant 8 : index
    %c0_76 = arith.constant 0 : index
    %240 = vector.load %arg11[%c8_75, %c0_76] : memref<32x32xbf16, #tpu.memory_space<vmem>>, vector<8x32xbf16>
    %cst_77 = arith.constant dense<0.000000e+00> : vector<8x32xf32>
    %241 = tpu.matmul %239, %240, %cst_77 {dimension_numbers = #tpu.dot_dimension_numbers<[1], [0], [0], [1], [0, 0, 1, 1], [], []>} : vector<8x8xbf16>, vector<8x32xbf16>, vector<8x32xf32> -> vector<8x32xf32>
    %242 = arith.addf %206, %241 : vector<8x32xf32>
    %243 = vector.extract_strided_slice %21 {offsets = [8, 16], sizes = [8, 8], strides = [1, 1]} : vector<16x96xf32> to vector<8x8xf32>
    %cst_78 = arith.constant 0.353553385 : f32
    %244 = vector.broadcast %cst_78 : f32 to vector<8x8xf32>
    %245 = arith.mulf %243, %244 : vector<8x8xf32>
    %246 = arith.truncf %245 : vector<8x8xf32> to vector<8x8xbf16>
    %cst_79 = arith.constant 0xFF800000 : f32
    %247 = vector.broadcast %cst_79 : f32 to vector<8x1xf32>
    %cst_80 = arith.constant 0.000000e+00 : f32
    %248 = vector.broadcast %cst_80 : f32 to vector<8x1xf32>
    %cst_81 = arith.constant 0.000000e+00 : f32
    %249 = vector.broadcast %cst_81 : f32 to vector<8x8xf32>
    %250 = vector.extract_strided_slice %21 {offsets = [8, 48], sizes = [8, 8], strides = [1, 1]} : vector<16x96xf32> to vector<8x8xf32>
    %251 = arith.truncf %250 : vector<8x8xf32> to vector<8x8xbf16>
    %252 = vector.extract_strided_slice %21 {offsets = [8, 80], sizes = [8, 8], strides = [1, 1]} : vector<16x96xf32> to vector<8x8xf32>
    %253 = arith.truncf %252 : vector<8x8xf32> to vector<8x8xbf16>
    %cst_82 = arith.constant dense<0.000000e+00> : vector<8x8xf32>
    %254 = tpu.matmul %246, %251, %cst_82 {dimension_numbers = #tpu.dot_dimension_numbers<[1], [1], [0], [0], [0, 0, 1, 0], [], []>} : vector<8x8xbf16>, vector<8x8xbf16>, vector<8x8xf32> -> vector<8x8xf32>
    %cst_83 = arith.constant dense<0xFF800000> : vector<8xf32>
    %255 = vector.multi_reduction <maximumf>, %254, %cst_83 [1] : vector<8x8xf32> to vector<8xf32>
    %256 = vector.shape_cast %255 : vector<8xf32> to vector<8x1xf32>
    %257 = arith.maximumf %247, %256 : vector<8x1xf32>
    %258 = arith.subf %247, %257 : vector<8x1xf32>
    %259 = math.exp %258 : vector<8x1xf32>
    %260 = vector.broadcast %257 : vector<8x1xf32> to vector<8x8xf32>
    %261 = arith.subf %254, %260 : vector<8x8xf32>
    %262 = math.exp %261 : vector<8x8xf32>
    %263 = arith.mulf %259, %248 : vector<8x1xf32>
    %cst_84 = arith.constant dense<0.000000e+00> : vector<8xf32>
    %264 = vector.multi_reduction <add>, %262, %cst_84 [1] : vector<8x8xf32> to vector<8xf32>
    %265 = vector.shape_cast %264 : vector<8xf32> to vector<8x1xf32>
    %266 = arith.addf %263, %265 : vector<8x1xf32>
    %267 = vector.broadcast %259 : vector<8x1xf32> to vector<8x8xf32>
    %268 = arith.mulf %267, %249 : vector<8x8xf32>
    %269 = arith.truncf %262 : vector<8x8xf32> to vector<8x8xbf16>
    %cst_85 = arith.constant dense<0.000000e+00> : vector<8x8xf32>
    %270 = tpu.matmul %269, %253, %cst_85 {dimension_numbers = #tpu.dot_dimension_numbers<[1], [0], [0], [1], [0, 0, 1, 1], [], []>} : vector<8x8xbf16>, vector<8x8xbf16>, vector<8x8xf32> -> vector<8x8xf32>
    %271 = arith.addf %268, %270 : vector<8x8xf32>
    %272 = tpu.reciprocal %266 {approx = true} : vector<8x1xf32> -> vector<8x1xf32>
    %273 = vector.broadcast %272 : vector<8x1xf32> to vector<8x8xf32>
    %274 = arith.mulf %271, %273 : vector<8x8xf32>
    %275 = arith.truncf %274 : vector<8x8xf32> to vector<8x8xbf16>
    %c16_86 = arith.constant 16 : index
    %c0_87 = arith.constant 0 : index
    %276 = vector.load %arg11[%c16_86, %c0_87] : memref<32x32xbf16, #tpu.memory_space<vmem>>, vector<8x32xbf16>
    %cst_88 = arith.constant dense<0.000000e+00> : vector<8x32xf32>
    %277 = tpu.matmul %275, %276, %cst_88 {dimension_numbers = #tpu.dot_dimension_numbers<[1], [0], [0], [1], [0, 0, 1, 1], [], []>} : vector<8x8xbf16>, vector<8x32xbf16>, vector<8x32xf32> -> vector<8x32xf32>
    %278 = arith.addf %242, %277 : vector<8x32xf32>
    %279 = vector.extract_strided_slice %21 {offsets = [8, 24], sizes = [8, 8], strides = [1, 1]} : vector<16x96xf32> to vector<8x8xf32>
    %cst_89 = arith.constant 0.353553385 : f32
    %280 = vector.broadcast %cst_89 : f32 to vector<8x8xf32>
    %281 = arith.mulf %279, %280 : vector<8x8xf32>
    %282 = arith.truncf %281 : vector<8x8xf32> to vector<8x8xbf16>
    %cst_90 = arith.constant 0xFF800000 : f32
    %283 = vector.broadcast %cst_90 : f32 to vector<8x1xf32>
    %cst_91 = arith.constant 0.000000e+00 : f32
    %284 = vector.broadcast %cst_91 : f32 to vector<8x1xf32>
    %cst_92 = arith.constant 0.000000e+00 : f32
    %285 = vector.broadcast %cst_92 : f32 to vector<8x8xf32>
    %286 = vector.extract_strided_slice %21 {offsets = [8, 56], sizes = [8, 8], strides = [1, 1]} : vector<16x96xf32> to vector<8x8xf32>
    %287 = arith.truncf %286 : vector<8x8xf32> to vector<8x8xbf16>
    %288 = vector.extract_strided_slice %21 {offsets = [8, 88], sizes = [8, 8], strides = [1, 1]} : vector<16x96xf32> to vector<8x8xf32>
    %289 = arith.truncf %288 : vector<8x8xf32> to vector<8x8xbf16>
    %cst_93 = arith.constant dense<0.000000e+00> : vector<8x8xf32>
    %290 = tpu.matmul %282, %287, %cst_93 {dimension_numbers = #tpu.dot_dimension_numbers<[1], [1], [0], [0], [0, 0, 1, 0], [], []>} : vector<8x8xbf16>, vector<8x8xbf16>, vector<8x8xf32> -> vector<8x8xf32>
    %cst_94 = arith.constant dense<0xFF800000> : vector<8xf32>
    %291 = vector.multi_reduction <maximumf>, %290, %cst_94 [1] : vector<8x8xf32> to vector<8xf32>
    %292 = vector.shape_cast %291 : vector<8xf32> to vector<8x1xf32>
    %293 = arith.maximumf %283, %292 : vector<8x1xf32>
    %294 = arith.subf %283, %293 : vector<8x1xf32>
    %295 = math.exp %294 : vector<8x1xf32>
    %296 = vector.broadcast %293 : vector<8x1xf32> to vector<8x8xf32>
    %297 = arith.subf %290, %296 : vector<8x8xf32>
    %298 = math.exp %297 : vector<8x8xf32>
    %299 = arith.mulf %295, %284 : vector<8x1xf32>
    %cst_95 = arith.constant dense<0.000000e+00> : vector<8xf32>
    %300 = vector.multi_reduction <add>, %298, %cst_95 [1] : vector<8x8xf32> to vector<8xf32>
    %301 = vector.shape_cast %300 : vector<8xf32> to vector<8x1xf32>
    %302 = arith.addf %299, %301 : vector<8x1xf32>
    %303 = vector.broadcast %295 : vector<8x1xf32> to vector<8x8xf32>
    %304 = arith.mulf %303, %285 : vector<8x8xf32>
    %305 = arith.truncf %298 : vector<8x8xf32> to vector<8x8xbf16>
    %cst_96 = arith.constant dense<0.000000e+00> : vector<8x8xf32>
    %306 = tpu.matmul %305, %289, %cst_96 {dimension_numbers = #tpu.dot_dimension_numbers<[1], [0], [0], [1], [0, 0, 1, 1], [], []>} : vector<8x8xbf16>, vector<8x8xbf16>, vector<8x8xf32> -> vector<8x8xf32>
    %307 = arith.addf %304, %306 : vector<8x8xf32>
    %308 = tpu.reciprocal %302 {approx = true} : vector<8x1xf32> -> vector<8x1xf32>
    %309 = vector.broadcast %308 : vector<8x1xf32> to vector<8x8xf32>
    %310 = arith.mulf %307, %309 : vector<8x8xf32>
    %311 = arith.truncf %310 : vector<8x8xf32> to vector<8x8xbf16>
    %c24_97 = arith.constant 24 : index
    %c0_98 = arith.constant 0 : index
    %312 = vector.load %arg11[%c24_97, %c0_98] : memref<32x32xbf16, #tpu.memory_space<vmem>>, vector<8x32xbf16>
    %cst_99 = arith.constant dense<0.000000e+00> : vector<8x32xf32>
    %313 = tpu.matmul %311, %312, %cst_99 {dimension_numbers = #tpu.dot_dimension_numbers<[1], [0], [0], [1], [0, 0, 1, 1], [], []>} : vector<8x8xbf16>, vector<8x32xbf16>, vector<8x32xf32> -> vector<8x32xf32>
    %314 = arith.addf %278, %313 : vector<8x32xf32>
    %c8_100 = arith.constant 8 : index
    %c0_101 = arith.constant 0 : index
    %315 = vector.load %arg14[%c8_100, %c0_101] : memref<16x32xf32, #tpu.memory_space<vmem>>, vector<8x32xf32>
    tpu.vector_store %arg14[%c8_100, %c0_101], %314 {strides = array<i32>} : memref<16x32xf32, #tpu.memory_space<vmem>>, vector<8x32xf32>,
    %c0_102 = arith.constant 0 : index
    %c0_103 = arith.constant 0 : index
    %316 = vector.load %arg14[%c0_102, %c0_103] : memref<16x32xf32, #tpu.memory_space<vmem>>, vector<16x32xf32>
    %317 = arith.addf %3, %316 : vector<16x32xf32>
    %c0_104 = arith.constant 0 : index
    %c0_105 = arith.constant 0 : index
    %318 = vector.load %arg8[%c0_104, %c0_105] : memref<1x32xf32, #tpu.memory_space<vmem>>, vector<1x32xf32>
    %319 = arith.mulf %317, %317 : vector<16x32xf32>
    %cst_106 = arith.constant dense<0.000000e+00> : vector<16xf32>
    %320 = vector.multi_reduction <add>, %319, %cst_106 [1] : vector<16x32xf32> to vector<16xf32>
    %321 = vector.shape_cast %320 : vector<16xf32> to vector<16x1xf32>
    %cst_107 = arith.constant 3.200000e+01 : f32
    %322 = vector.broadcast %cst_107 : f32 to vector<16x1xf32>
    %323 = arith.divf %321, %322 : vector<16x1xf32>
    %cst_108 = arith.constant 9.99999974E-6 : f32
    %324 = vector.broadcast %cst_108 : f32 to vector<16x1xf32>
    %325 = arith.addf %323, %324 : vector<16x1xf32>
    %326 = math.rsqrt %325 : vector<16x1xf32>
    %327 = vector.broadcast %326 : vector<16x1xf32> to vector<16x32xf32>
    %328 = arith.mulf %317, %327 : vector<16x32xf32>
    %329 = vector.broadcast %318 : vector<1x32xf32> to vector<16x32xf32>
    %330 = arith.mulf %329, %328 : vector<16x32xf32>
    %331 = arith.truncf %330 : vector<16x32xf32> to vector<16x32xbf16>
    %332 = arith.extui %0 : i1 to i32
    %c0_i32_109 = arith.constant 0 : i32
    %333 = arith.cmpi ne, %332, %c0_i32_109 : i32
    scf.if %333 {
      %c2_i32 = arith.constant 2 : i32
      %352 = tpu.memref_slice %arg15[%c2_i32] : memref<4x!tpu.dma_semaphore, #tpu.memory_space<semaphore_mem>> -> memref<1x!tpu.dma_semaphore, #tpu.memory_space<semaphore_mem>>
      %353 = tpu.memref_squeeze %352 : memref<1x!tpu.dma_semaphore, #tpu.memory_space<semaphore_mem>> -> memref<!tpu.dma_semaphore, #tpu.memory_space<semaphore_mem>>
      tpu.wait_dma2 semaphore(%353 : memref<!tpu.dma_semaphore, #tpu.memory_space<semaphore_mem>>) src(%arg5 : memref<32x256xbf16, #tpu.memory_space<any>>) dst(%arg12 : memref<32x256xbf16, #tpu.memory_space<vmem>>)
      %c3_i32 = arith.constant 3 : i32
      %354 = tpu.memref_slice %arg15[%c3_i32] : memref<4x!tpu.dma_semaphore, #tpu.memory_space<semaphore_mem>> -> memref<1x!tpu.dma_semaphore, #tpu.memory_space<semaphore_mem>>
      %355 = tpu.memref_squeeze %354 : memref<1x!tpu.dma_semaphore, #tpu.memory_space<semaphore_mem>> -> memref<!tpu.dma_semaphore, #tpu.memory_space<semaphore_mem>>
      tpu.wait_dma2 semaphore(%355 : memref<!tpu.dma_semaphore, #tpu.memory_space<semaphore_mem>>) src(%arg6 : memref<128x32xbf16, #tpu.memory_space<any>>) dst(%arg13 : memref<128x32xbf16, #tpu.memory_space<vmem>>)
    } else {
    }
    %cst_110 = arith.constant 0.000000e+00 : f32
    %334 = vector.broadcast %cst_110 : f32 to vector<16x32xf32>
    %c0_111 = arith.constant 0 : index
    %c0_112 = arith.constant 0 : index
    %335 = vector.load %arg12[%c0_111, %c0_112] : memref<32x256xbf16, #tpu.memory_space<vmem>>, vector<32x128xbf16>
    %cst_113 = arith.constant dense<0.000000e+00> : vector<16x128xf32>
    %336 = tpu.matmul %331, %335, %cst_113 {dimension_numbers = #tpu.dot_dimension_numbers<[1], [0], [0], [1], [0, 0, 1, 1], [], []>} : vector<16x32xbf16>, vector<32x128xbf16>, vector<16x128xf32> -> vector<16x128xf32>
    %c0_114 = arith.constant 0 : index
    %c128 = arith.constant 128 : index
    %337 = vector.load %arg12[%c0_114, %c128] : memref<32x256xbf16, #tpu.memory_space<vmem>>, vector<32x128xbf16>
    %cst_115 = arith.constant dense<0.000000e+00> : vector<16x128xf32>
    %338 = tpu.matmul %331, %337, %cst_115 {dimension_numbers = #tpu.dot_dimension_numbers<[1], [0], [0], [1], [0, 0, 1, 1], [], []>} : vector<16x32xbf16>, vector<32x128xbf16>, vector<16x128xf32> -> vector<16x128xf32>
    %339 = arith.negf %336 : vector<16x128xf32>
    %340 = math.exp %339 : vector<16x128xf32>
    %cst_116 = arith.constant 1.000000e+00 : f32
    %341 = vector.broadcast %cst_116 : f32 to vector<16x128xf32>
    %342 = arith.addf %341, %340 : vector<16x128xf32>
    %343 = arith.divf %341, %342 : vector<16x128xf32>
    %344 = arith.mulf %336, %343 : vector<16x128xf32>
    %345 = arith.mulf %344, %338 : vector<16x128xf32>
    %346 = arith.truncf %345 : vector<16x128xf32> to vector<16x128xbf16>
    %c0_117 = arith.constant 0 : index
    %c0_118 = arith.constant 0 : index
    %347 = vector.load %arg13[%c0_117, %c0_118] : memref<128x32xbf16, #tpu.memory_space<vmem>>, vector<128x32xbf16>
    %cst_119 = arith.constant dense<0.000000e+00> : vector<16x32xf32>
    %348 = tpu.matmul %346, %347, %cst_119 {dimension_numbers = #tpu.dot_dimension_numbers<[1], [0], [0], [1], [0, 0, 1, 1], [], []>} : vector<16x128xbf16>, vector<128x32xbf16>, vector<16x32xf32> -> vector<16x32xf32>
    %349 = arith.addf %334, %348 : vector<16x32xf32>
    %350 = arith.addf %317, %349 : vector<16x32xf32>
    %c0_120 = arith.constant 0 : index
    %c0_121 = arith.constant 0 : index
    %351 = vector.load %arg9[%c0_120, %c0_121] : memref<16x32xf32, #tpu.memory_space<vmem>>, vector<16x32xf32>
    tpu.vector_store %arg9[%c0_120, %c0_121], %350 {strides = array<i32>} : memref<16x32xf32, #tpu.memory_space<vmem>>, vector<16x32xf32>,
    return
  }
  func.func @transform_0(%arg0: i32, %arg1: i32) -> (i32, i32) {
    %c1_i32 = arith.constant 1 : i32
    %0 = arith.muli %arg0, %c1_i32 : i32
    %1 = arith.addi %0, %arg1 : i32
    %c0_i32 = arith.constant 0 : i32
    %c0_i32_0 = arith.constant 0 : i32
    return %1, %c0_i32 : i32, i32
  }
  func.func @transform_5(%arg0: i32, %arg1: i32) -> (i32, i32) {
    %c0_i32 = arith.constant 0 : i32
    %c0_i32_0 = arith.constant 0 : i32
    %c0_i32_1 = arith.constant 0 : i32
    return %c0_i32, %c0_i32_0 : i32, i32
  }
  func.func @transform_6(%arg0: i32, %arg1: i32) -> (i32, i32) {
    %c0_i32 = arith.constant 0 : i32
    %c0_i32_0 = arith.constant 0 : i32
    %c0_i32_1 = arith.constant 0 : i32
    return %c0_i32, %c0_i32_0 : i32, i32
  }
  func.func @transform_7(%arg0: i32, %arg1: i32) -> (i32, i32) {
    %c1_i32 = arith.constant 1 : i32
    %0 = arith.muli %arg0, %c1_i32 : i32
    %1 = arith.addi %0, %arg1 : i32
    %c0_i32 = arith.constant 0 : i32
    %c0_i32_0 = arith.constant 0 : i32
    return %1, %c0_i32 : i32, i32
  }
}

</mosaic_0001>

<bundles_post_ra>
// kernel: tpu_custom_call.1
= control target key start
LH: loop header
LB: loop body
LE: loop exit
PB: predicated region body
PF: predicated region fallthrough
CT: control target
= control target key end

     0   :  { %12 = vsyncpa [#allocation9], 0  ;;  %s2856_s0 = inlined_call_operand.vmem [shape: f32[16,32], index: 0, kind: input, shape index: {}]   ;;  %s2857_s1 = inlined_call_operand.vmem [shape: bf16[32,96], index: 1, kind: input, shape index: {}]   ;;  %s2858_s2 = inlined_call_operand.vmem [shape: bf16[32,32], index: 2, kind: input, shape index: {}]   ;;  %s2859_s3 = inlined_call_operand.vmem [shape: bf16[32,256], index: 3, kind: input, shape index: {}]   ;;  %s2860_s4 = inlined_call_operand.vmem [shape: bf16[128,32], index: 4, kind: input, shape index: {}]   ;;  %s2861_s5 = inlined_call_operand.vmem [shape: f32[1,32], index: 5, kind: input, shape index: {}]   ;;  %s2862_s6 = inlined_call_operand.vmem [shape: f32[1,32], index: 6, kind: input, shape index: {}]   ;;  %s2863_s7 = inlined_call_operand.hbm [shape: f32[16,32], index: 7, kind: output, shape index: {}]  }
   0x1   :  { %v81_v0 = vld [vmem:[%s2857_s1] sm:$0xff]  ;;  %v83_v1 = vld [vmem:[%s2857_s1 + $0x8] sm:$0xff] }
   0x2   :  { %82 = vst [vmem:[#allocation2] sm:$0xff] %v81_v0  ;;  %84 = vst [vmem:[#allocation2 + $0x8] sm:$0xff] %v83_v1 }
   0x3   :  { %92 = vsyncadd [#allocation7], 256  ;;  %v127_v2 = vld [vmem:[%s2858_s2] sm:$0xff]  ;;  %v129_v3 = vld [vmem:[%s2858_s2 + $0x8] sm:$0xff] }
   0x4   :  { %128 = vst [vmem:[#allocation3] sm:$0xff] %v127_v2  ;;  %130 = vst [vmem:[#allocation3 + $0x8] sm:$0xff] %v129_v3 }
   0x5   :  { %138 = vsyncadd [#allocation7 + $0x1], 256  ;;  %v173_v4 = vld [vmem:[%s2859_s3] sm:$0xff]  ;;  %v175_v5 = vld [vmem:[%s2859_s3 + $0x8] sm:$0xff] }
   0x6   :  { %174 = vst [vmem:[#allocation4] sm:$0xff] %v173_v4  ;;  %176 = vst [vmem:[#allocation4 + $0x8] sm:$0xff] %v175_v5  ;;  %v177_v6 = vld [vmem:[%s2859_s3 + $0x10] sm:$0xff]  ;;  %v179_v7 = vld [vmem:[%s2859_s3 + $0x18] sm:$0xff] }
   0x7   :  { %178 = vst [vmem:[#allocation4 + $0x10] sm:$0xff] %v177_v6  ;;  %180 = vst [vmem:[#allocation4 + $0x18] sm:$0xff] %v179_v7 }
   0x8   :  { %188 = vsyncadd [#allocation7 + $0x2], 512  ;;  %v223_v8 = vld [vmem:[%s2860_s4] sm:$0xff]  ;;  %v225_v9 = vld [vmem:[%s2860_s4 + $0x8] sm:$0xff]  ;;  %vm252_vm0 = vcmask 261120  }
   0x9   :  { %224 = vst [vmem:[#allocation5] sm:$0xff] %v223_v8  ;;  %226 = vst [vmem:[#allocation5 + $0x8] sm:$0xff] %v225_v9  ;;  %v227_v10 = vld [vmem:[%s2860_s4 + $0x10] sm:$0xff]  ;;  %v229_v11 = vld [vmem:[%s2860_s4 + $0x18] sm:$0xff] }
   0xa   :  { %v231_v12 = vld [vmem:[%s2860_s4 + $0x20] sm:$0xff]  ;;  %228 = vst [vmem:[#allocation5 + $0x10] sm:$0xff] %v227_v10  ;;  %230 = vst [vmem:[#allocation5 + $0x18] sm:$0xff] %v229_v11  ;;  %v233_v13 = vld [vmem:[%s2860_s4 + $0x28] sm:$0xff] }
   0xb   :  { %232 = vst [vmem:[#allocation5 + $0x20] sm:$0xff] %v231_v12  ;;  %v235_v14 = vld [vmem:[%s2860_s4 + $0x30] sm:$0xff]  ;;  %v237_v15 = vld [vmem:[%s2860_s4 + $0x38] sm:$0xff]  ;;  %234 = vst [vmem:[#allocation5 + $0x28] sm:$0xff] %v233_v13 }
   0xc   :  { %236 = vst [vmem:[#allocation5 + $0x30] sm:$0xff] %v235_v14  ;;  %238 = vst [vmem:[#allocation5 + $0x38] sm:$0xff] %v237_v15  ;;  %v2583_v16 = vld [vmem:[%s2856_s0] sm:$0xff]  ;;  %v2588_v17 = vld [vmem:[%s2856_s0 + $0x8] sm:$0xff] }
   0xd   :  { %v250_v18 = vmul.f32 %v2583_v16, %v2583_v16  ;;  %v251_v19 = vmul.f32 %v2588_v17, %v2588_v17 }
   0xe   :  { %246 = vsyncadd [#allocation7 + $0x3], 1024  ;;  %v2049_v31 = vld [vmem:[%s2861_s5] ss:$0 sm:$0xff] }
   0xf   :  { %v253_v20 = vsel %vm252_vm0, %v250_v18, 0.0  ;;  %v256_v21 = vsel %vm252_vm0, %v251_v19, 0.0 }
  0x10   :  { %254 = vadd.xlane.f32.xlu0 %v253_v20 }
  0x14   :  { %257 = vadd.xlane.f32.xlu0 %v256_v21 }
  0x99   :  { %v255_v22 = vpop.xlane.xlu0 %254 }
  0x9a   :  { %v260_v23 = vmul.f32 0.03125, %v255_v22 }
  0x9c   :  { %v262_v24 = vadd.f32 1e-05, %v260_v23 }
  0x9d   :  { %v258_v25 = vpop.xlane.xlu0 %257 }
  0x9e   :  { %2368 = vrsqrt.f32 %v262_v24  ;;  %v261_v26 = vmul.f32 0.03125, %v258_v25 }
  0xa0   :  { %v263_v27 = vadd.f32 1e-05, %v261_v26 }
  0xa2   :  { %2370 = vrsqrt.f32 %v263_v27 }
  0xab   :  { %v2369_v28 = vpop.eup %2368 }
  0xac   :  { %v266_v29 = vmul.f32 %v2369_v28, %v2583_v16 }
  0xae   :  { %v274_v33 = vmul.f32 %v2049_v31, %v266_v29 }
  0xaf   :  { %v2371_v30 = vpop.eup %2370 }
  0xb0   :  { %v267_v32 = vmul.f32 %v2371_v30, %v2588_v17 }
  0xb2   :  { %v275_v34 = vmul.f32 %v2049_v31, %v267_v32 }
  0xb4   :  { %v276_v35 = vpack.c.bf16 %v275_v34, %v274_v33 }
  0xb5   :  { %2466 = dma.done.wait [#allocation7], 256 }
  0xb6   :  { %2467 = vsyncadd [#allocation7], 4294967040  ;;  %v2476_v36 = vmov 0.0   ;;  %vm2477_vm1 = vmmov 0   ;;  %v2372_v37 = vld [vmem:[#allocation2 + $0x8] sm:$0xff]   ;;  %v2373_v38 = vld [vmem:[#allocation2] sm:$0xff]  }
  0xb7   :  { %2164 = vmatprep.subr.bf16.mxu0 %v2476_v36  ;;  %2168 = vmatprep.mubr.msk.bf16.mxu0 %vm2477_vm1, %v2476_v36 }
  0xb8   :  { %2165 = vmatpush3.bf16.msra.mxu0 %v2372_v37  ;;  %2184 = vmatprep.subr.bf16.mxu1 %v2476_v36 }
  0xb9   :  { %2166 = vmatprep.subr.bf16.mxu0 %v2476_v36  ;;  %2186 = vmatprep.mubr.msk.bf16.mxu1 %vm2477_vm1, %v2476_v36 }
  0xbc   :  { %2167 = vmatpush3.bf16.msra.mxu0 %v2373_v38 }
  0xbd   :  { %2172 = vmatprep.subr.bf16.mxu0 %v2476_v36 }
  0xbf   :  { %2169 = vmatmul.mubr.msk.bf16.vlgmr.msra.gmra.mxu0 %vm252_vm0, %v276_v35 }
  0xc0   :  { %2174 = vmatprep.mubr.msk.bf16.mxu0 %vm2477_vm1, %v2476_v36 }
 0x17f   :  { %v337_v39 = vpop.f32.mrf.mxu0 }
 0x180   :  { %v2608_v43 = vpack.c.bf16 %v337_v39, %v337_v39  ;;  %v352_v44 = vmul.f32 0.35355338, %v337_v39 }
 0x181   :  { %v2170_v40 = vpop.f32.mrf.mxu0 }
 0x183   :  { %v2606_v41 = vpop.f32.mrf.mxu0 }
 0x185   :  { %v2171_v42 = vpop.f32.mrf.mxu0 }
 0x186   :  { %2468 = dma.done.wait [#allocation7 + $0x1], 256 }
 0x187   :  { %2469 = vsyncadd [#allocation7 + $0x1], 4294967040  ;;  %s2478_s5 = smov 96   ;;  %v2618_v45 = vpack.c.bf16 %v352_v44, %v352_v44  ;;  %s2479_s11 = smov 120   ;;  %vm358_vm2 = vcmask 64512   ;;  %vm425_vm3 = vcmask 1043456  }
 0x188   :  { %356 = vrot.lane.b32.xlu0 %v2608_v43, %s2478_s5  ;;  %s2480_s1 = smov 88   ;;  %s2481_s12 = smov 56   ;;  %v473_v13 = vld [vmem:[#allocation3] sm:$0xf]  ;;  %v592_v15 = vld [vmem:[#allocation3 + $0x4] sm:$0xf] }
 0x189   :  { %475 = vrot.lane.b32.xlu1 %v2618_v45, %s2479_s11  ;;  %s2482_s13 = smov 64   ;;  %s2483_s14 = smov 80   ;;  %v643_v14 = vsel %vm425_vm3, %v473_v13, 0  ;;  %v597_v18 = vsel %vm425_vm3, %v592_v15, 0 }
 0x18a   :  { %s2484_s15 = smov 112   ;;  %s2485_s2 = smov 72  }
 0x18b   :  { %s2486_s16 = smov 48   ;;  %s2487_s17 = smov 104  }
 0x18c   :  { %477 = vrot.lane.b32.xlu0 %v2608_v43, %s2480_s1  ;;  %s2488_s18 = smov 40  }
 0x1fa   :  { %v357_v46 = vpop.permute.xlu0 %356 }
 0x1fb   :  { %v363_v47 = vsel %vm358_vm2, %v357_v46, 0  ;;  %v476_v50 = vpop.permute.xlu1 %475 }
 0x1fc   :  { %2173 = vmatpush3.bf16.xpose.msra.mxu0 %v363_v47 }
 0x1fd   :  { %2178 = vmatprep.subr.bf16.mxu0 %v2476_v36 }
 0x1fe   :  { %v478_v48 = vpop.permute.xlu0 %477 }
 0x1ff   :  { %v483_v49 = vsel %vm358_vm2, %v478_v48, 0 }
 0x200   :  { %2185 = vmatpush3.bf16.xpose.msra.mxu1 %v483_v49 }
 0x201   :  { %2196 = vmatprep.subr.bf16.mxu1 %v2476_v36 }
 0x203   :  { %2175 = vmatmul.mubr.msk.bf16.vlgmr.msra.gmra.mxu0 %vm358_vm2, %v2618_v45 }
 0x204   :  { %2180 = vmatprep.mubr.msk.bf16.mxu0 %vm2477_vm1, %v2476_v36 }
 0x207   :  { %2187 = vmatmul.mubr.msk.bf16.vlgmr.msra.gmra.mxu1 %vm358_vm2, %v476_v50 }
 0x208   :  { %2198 = vmatprep.mubr.msk.bf16.mxu1 %vm2477_vm1, %v2476_v36  ;;  %2197 = vmatpush3.bf16.msra.mxu1 %v597_v18  ;;  %v2696_v18 = vpack.c.bf16 %v2606_v41, %v2606_v41 }
 0x209   :  { %2208 = vmatprep.subr.bf16.mxu1 %v2476_v36 }
 0x2c3   :  { %v399_v51 = vpop.f32.mrf.mxu0 }
 0x2c4   :  { %v405_v52 = vsel %vm358_vm2, %v399_v51, -inf }
 0x2c5   :  { %406 = vmax.xlane.f32.xlu1 %v405_v52  ;;  %v2176_v53 = vpop.f32.mrf.mxu0 }
 0x2c7   :  { %v402_v54 = vpop.f32.mrf.mxu0  ;;  %v519_v55 = vpop.f32.mrf.mxu1 }
 0x2c8   :  { %v525_v56 = vsel %vm358_vm2, %v519_v55, -inf }
 0x2c9   :  { %526 = vmax.xlane.f32.xlu0 %v525_v56  ;;  %v2177_v57 = vpop.f32.mrf.mxu0  ;;  %v2188_v58 = vpop.f32.mrf.mxu1 }
 0x2cb   :  { %v522_v59 = vpop.f32.mrf.mxu1 }
 0x2cd   :  { %v2189_v60 = vpop.f32.mrf.mxu1 }
 0x2d6   :  { %540 = vrot.lane.b32.xlu1 %v2608_v43, %s2481_s12 }
 0x2df   :  { %420 = vrot.lane.b32.xlu0 %v2608_v43, %s2482_s13 }
 0x2e3   :  { %687 = vrot.lane.b32.xlu0 %v2608_v43, %s2483_s14 }
 0x2e7   :  { %685 = vrot.lane.b32.xlu0 %v2618_v45, %s2484_s15 }
 0x34e   :  { %v407_v61 = vpop.xlane.xlu1 %406 }
 0x34f   :  { %v411_v62 = vsub.f32 %v399_v51, %v407_v61  ;;  %v408_v19 = vsub.f32 -inf, %v407_v61 }
 0x351   :  { %v412_v63 = vmul.f32 1.442695, %v411_v62  ;;  %v409_v20 = vmul.f32 1.442695, %v408_v19 }
 0x352   :  { %v527_v0 = vpop.xlane.xlu0 %526  ;;  %v541_v5 = vpop.permute.xlu1 %540 }
 0x353   :  { %v531_v1 = vsub.f32 %v519_v55, %v527_v0  ;;  %2374 = vpow2.f32 %v412_v63  ;;  %v546_v7 = vsel %vm425_vm3, %v541_v5, 0  ;;  %v528_v21 = vsub.f32 -inf, %v527_v0 }
 0x355   :  { %v532_v2 = vmul.f32 1.442695, %v531_v1  ;;  %v529_v23 = vmul.f32 1.442695, %v528_v21 }
 0x356   :  { %v421_v3 = vpop.permute.xlu0 %420 }
 0x357   :  { %v427_v4 = vsel %vm425_vm3, %v421_v3, 0  ;;  %2376 = vpow2.f32 %v532_v2 }
 0x358   :  { %2179 = vmatpush3.bf16.msra.mxu0 %v427_v4  ;;  %2378 = vpow2.f32 %v409_v20 }
 0x359   :  { %2190 = vmatprep.subr.bf16.mxu0 %v2476_v36  ;;  %2380 = vpow2.f32 %v529_v23 }
 0x35a   :  { %v688_v22 = vpop.permute.xlu0 %687 }
 0x35b   :  { %v693_v51 = vsel %vm358_vm2, %v688_v22, 0 }
 0x35e   :  { %v686_v24 = vpop.permute.xlu0 %685 }
 0x360   :  { %v2375_v6 = vpop.eup %2374 }
 0x361   :  { %v415_v8 = vsel %vm358_vm2, %v2375_v6, 0.0  ;;  %v419_v9 = vpack.c.bf16 %v2375_v6, %v2375_v6 }
 0x362   :  { %416 = vadd.xlane.f32.xlu0 %v415_v8 }
 0x363   :  { %2181 = vmatmul.mubr.msk.bf16.vlgmr.msra.gmra.mxu0 %vm358_vm2, %v419_v9 }
 0x364   :  { %v2377_v10 = vpop.eup %2376  ;;  %2191 = vmatpush3.bf16.msra.mxu0 %v546_v7  ;;  %2192 = vmatprep.mubr.msk.bf16.mxu0 %vm2477_vm1, %v2476_v36 }
 0x365   :  { %v535_v11 = vsel %vm358_vm2, %v2377_v10, 0.0  ;;  %2202 = vmatprep.subr.bf16.mxu0 %v2476_v36  ;;  %v539_v12 = vpack.c.bf16 %v2377_v10, %v2377_v10  ;;  %v2379_v25 = vpop.eup %2378 }
 0x366   :  { %536 = vadd.xlane.f32.xlu1 %v535_v11  ;;  %v414_v27 = vmul.f32 0.0, %v2379_v25  ;;  %v2381_v29 = vpop.eup %2380 }
 0x367   :  { %v534_v31 = vmul.f32 0.0, %v2381_v29 }
 0x36b   :  { %2193 = vmatmul.mubr.msk.bf16.vlgmr.msra.gmra.mxu0 %vm358_vm2, %v539_v12 }
 0x36c   :  { %2204 = vmatprep.mubr.msk.bf16.mxu0 %vm2477_vm1, %v2476_v36  ;;  %2203 = vmatpush3.bf16.msra.mxu0 %v643_v14  ;;  %v802_v14 = vld [vmem:[#allocation3 + $0x8] sm:$0xf] }
 0x36d   :  { %2214 = vmatprep.subr.bf16.mxu0 %v2476_v36  ;;  %v807_v15 = vsel %vm425_vm3, %v802_v14, 0 }
 0x378   :  { %852 = vrot.lane.b32.xlu0 %v2608_v43, %s2485_s2 }
 0x3eb   :  { %v417_v26 = vpop.xlane.xlu0 %416 }
 0x3ec   :  { %v418_v28 = vadd.f32 %v417_v26, %v414_v27 }
 0x3ee   :  { %2382 = vrcp.f32 %v418_v28 }
 0x3ef   :  { %v537_v30 = vpop.xlane.xlu1 %536  ;;  %v853_v9 = vpop.permute.xlu0 %852 }
 0x3f0   :  { %v538_v32 = vadd.f32 %v537_v30, %v534_v31  ;;  %v858_v11 = vsel %vm358_vm2, %v853_v9, 0 }
 0x3f2   :  { %2384 = vrcp.f32 %v538_v32 }
 0x3fb   :  { %v2383_v35 = vpop.eup %2382 }
 0x3ff   :  { %v2385_v47 = vpop.eup %2384 }
 0x423   :  { %v463_v33 = vpop.f32.mrf.mxu0 }
 0x424   :  { %v469_v34 = vadd.f32 %v463_v33, %v414_v27 }
 0x425   :  { %v2182_v37 = vpop.f32.mrf.mxu0 }
 0x426   :  { %v471_v38 = vmul.f32 %v2383_v35, %v469_v34 }
 0x427   :  { %v466_v39 = vpop.f32.mrf.mxu0 }
 0x428   :  { %v472_v40 = vpack.c.bf16 %v471_v38, %v471_v38  ;;  %v1016_v39 = vmul.f32 0.35355338, %v2606_v41 }
 0x429   :  { %v2183_v42 = vpop.f32.mrf.mxu0 }
 0x42a   :  { %2205 = vmatmul.mubr.msk.bf16.vlgmr.msra.gmra.mxu0 %vm358_vm2, %v472_v40  ;;  %v2709_v40 = vpack.c.bf16 %v1016_v39, %v1016_v39 }
 0x42b   :  { %v582_v44 = vpop.f32.mrf.mxu0  ;;  %2216 = vmatprep.mubr.msk.bf16.mxu0 %vm2477_vm1, %v2476_v36 }
 0x42c   :  { %v588_v46 = vadd.f32 %v582_v44, %v534_v31 }
 0x42d   :  { %v2194_v48 = vpop.f32.mrf.mxu0 }
 0x42e   :  { %v590_v49 = vmul.f32 %v2385_v47, %v588_v46 }
 0x42f   :  { %v585_v50 = vpop.f32.mrf.mxu0 }
 0x430   :  { %v591_v52 = vpack.c.bf16 %v590_v49, %v590_v49 }
 0x431   :  { %v2195_v53 = vpop.f32.mrf.mxu0 }
 0x432   :  { %2199 = vmatmul.mubr.msk.bf16.vlgmr.msra.gmra.mxu1 %vm358_vm2, %v591_v52 }
 0x433   :  { %2209 = vmatpush3.bf16.xpose.msra.mxu1 %v693_v51  ;;  %2210 = vmatprep.mubr.msk.bf16.mxu1 %vm2477_vm1, %v2476_v36 }
 0x434   :  { %2220 = vmatprep.subr.bf16.mxu1 %v2476_v36 }
 0x43a   :  { %2211 = vmatmul.mubr.msk.bf16.vlgmr.msra.gmra.mxu1 %vm358_vm2, %v686_v24 }
 0x43b   :  { %2222 = vmatprep.mubr.msk.bf16.mxu1 %vm2477_vm1, %v2476_v36  ;;  %2221 = vmatpush3.bf16.msra.mxu1 %v807_v15 }
 0x43c   :  { %2232 = vmatprep.subr.bf16.mxu1 %v2476_v36 }
 0x4ea   :  { %v679_v54 = vpop.f32.mrf.mxu0 }
 0x4ec   :  { %v2206_v55 = vpop.f32.mrf.mxu0 }
 0x4ee   :  { %v682_v56 = vpop.f32.mrf.mxu0 }
 0x4f0   :  { %v2207_v57 = vpop.f32.mrf.mxu0 }
 0x4f2   :  { %v633_v58 = vpop.f32.mrf.mxu1 }
 0x4f3   :  { %v2674_v59 = vadd.f32 %v679_v54, %v633_v58 }
 0x4f4   :  { %v2200_v60 = vpop.f32.mrf.mxu1 }
 0x4f6   :  { %v636_v61 = vpop.f32.mrf.mxu1 }
 0x4f7   :  { %v967_v61 = vld [vmem:[#allocation3 + $0xc] sm:$0xf] }
 0x4f8   :  { %v2201_v62 = vpop.f32.mrf.mxu1 }
 0x4f9   :  { %v972_v62 = vsel %vm425_vm3, %v967_v61, 0 }
 0x4fa   :  { %v729_v63 = vpop.f32.mrf.mxu1 }
 0x4fb   :  { %v735_v0 = vsel %vm358_vm2, %v729_v63, -inf }
 0x4fc   :  { %736 = vmax.xlane.f32.xlu1 %v735_v0  ;;  %v2212_v1 = vpop.f32.mrf.mxu1 }
 0x4fe   :  { %v732_v2 = vpop.f32.mrf.mxu1 }
 0x500   :  { %v2213_v3 = vpop.f32.mrf.mxu1 }
 0x50d   :  { %750 = vrot.lane.b32.xlu1 %v2608_v43, %s2486_s16 }
 0x511   :  { %850 = vrot.lane.b32.xlu1 %v2618_v45, %s2487_s17 }
 0x585   :  { %v737_v4 = vpop.xlane.xlu1 %736 }
 0x586   :  { %v741_v5 = vsub.f32 %v729_v63, %v737_v4  ;;  %v738_v19 = vsub.f32 -inf, %v737_v4 }
 0x588   :  { %v742_v6 = vmul.f32 1.442695, %v741_v5  ;;  %v739_v20 = vmul.f32 1.442695, %v738_v19 }
 0x589   :  { %v751_v7 = vpop.permute.xlu1 %750 }
 0x58a   :  { %v756_v8 = vsel %vm425_vm3, %v751_v7, 0  ;;  %2386 = vpow2.f32 %v742_v6 }
 0x58b   :  { %2215 = vmatpush3.bf16.msra.mxu0 %v756_v8  ;;  %2388 = vpow2.f32 %v739_v20 }
 0x58c   :  { %2226 = vmatprep.subr.bf16.mxu0 %v2476_v36 }
 0x58d   :  { %v851_v45 = vpop.permute.xlu1 %850 }
 0x597   :  { %v2387_v10 = vpop.eup %2386 }
 0x598   :  { %v745_v12 = vsel %vm358_vm2, %v2387_v10, 0.0  ;;  %v749_v13 = vpack.c.bf16 %v2387_v10, %v2387_v10  ;;  %v2389_v21 = vpop.eup %2388 }
 0x599   :  { %746 = vadd.xlane.f32.xlu1 %v745_v12  ;;  %v744_v23 = vmul.f32 0.0, %v2389_v21 }
 0x59a   :  { %2217 = vmatmul.mubr.msk.bf16.vlgmr.msra.gmra.mxu0 %vm358_vm2, %v749_v13 }
 0x59b   :  { %2227 = vmatpush3.bf16.xpose.msra.mxu0 %v858_v11  ;;  %2228 = vmatprep.mubr.msk.bf16.mxu0 %vm2477_vm1, %v2476_v36 }
 0x59c   :  { %2238 = vmatprep.subr.bf16.mxu0 %v2476_v36 }
 0x5a2   :  { %2229 = vmatmul.mubr.msk.bf16.vlgmr.msra.gmra.mxu0 %vm358_vm2, %v851_v45 }
 0x5a3   :  { %2240 = vmatprep.mubr.msk.bf16.mxu0 %vm2477_vm1, %v2476_v36  ;;  %2239 = vmatpush3.bf16.msra.mxu0 %v972_v62 }
 0x5a4   :  { %2250 = vmatprep.subr.bf16.mxu0 %v2476_v36 }
 0x5aa   :  { %1020 = vrot.lane.b32.xlu1 %v2696_v18, %s2478_s5 }
 0x5ae   :  { %1139 = vrot.lane.b32.xlu1 %v2696_v18, %s2480_s1 }
 0x622   :  { %v747_v22 = vpop.xlane.xlu1 %746 }
 0x623   :  { %v748_v24 = vadd.f32 %v747_v22, %v744_v23 }
 0x625   :  { %2390 = vrcp.f32 %v748_v24 }
 0x626   :  { %v1021_v41 = vpop.permute.xlu1 %1020 }
 0x627   :  { %v1026_v50 = vsel %vm358_vm2, %v1021_v41, 0 }
 0x62a   :  { %v1140_v52 = vpop.permute.xlu1 %1139 }
 0x62b   :  { %v1145_v53 = vsel %vm358_vm2, %v1140_v52, 0 }
 0x632   :  { %v2391_v27 = vpop.eup %2390 }
 0x65a   :  { %v792_v25 = vpop.f32.mrf.mxu0 }
 0x65b   :  { %v798_v26 = vadd.f32 %v792_v25, %v744_v23 }
 0x65c   :  { %v2218_v28 = vpop.f32.mrf.mxu0 }
 0x65d   :  { %v800_v29 = vmul.f32 %v2391_v27, %v798_v26 }
 0x65e   :  { %v795_v30 = vpop.f32.mrf.mxu0 }
 0x65f   :  { %v801_v31 = vpack.c.bf16 %v800_v29, %v800_v29 }
 0x660   :  { %v2219_v32 = vpop.f32.mrf.mxu0 }
 0x661   :  { %2223 = vmatmul.mubr.msk.bf16.vlgmr.msra.gmra.mxu1 %vm358_vm2, %v801_v31 }
 0x662   :  { %v894_v33 = vpop.f32.mrf.mxu0  ;;  %2234 = vmatprep.mubr.msk.bf16.mxu1 %vm2477_vm1, %v2476_v36 }
 0x663   :  { %v900_v34 = vsel %vm358_vm2, %v894_v33, -inf }
 0x664   :  { %901 = vmax.xlane.f32.xlu0 %v900_v34  ;;  %v2230_v35 = vpop.f32.mrf.mxu0 }
 0x666   :  { %v897_v37 = vpop.f32.mrf.mxu0 }
 0x668   :  { %v2231_v38 = vpop.f32.mrf.mxu0 }
 0x67a   :  { %915 = vrot.lane.b32.xlu0 %v2608_v43, %s2488_s18 }
 0x67e   :  { %1137 = vrot.lane.b32.xlu0 %v2709_v40, %s2479_s11 }
 0x6ed   :  { %v902_v42 = vpop.xlane.xlu0 %901 }
 0x6ee   :  { %v906_v44 = vsub.f32 %v894_v33, %v902_v42  ;;  %v903_v63 = vsub.f32 -inf, %v902_v42 }
 0x6f0   :  { %v907_v46 = vmul.f32 1.442695, %v906_v44  ;;  %v904_v0 = vmul.f32 1.442695, %v903_v63 }
 0x6f1   :  { %v916_v47 = vpop.permute.xlu0 %915 }
 0x6f2   :  { %v921_v48 = vsel %vm425_vm3, %v916_v47, 0  ;;  %2392 = vpow2.f32 %v907_v46 }
 0x6f3   :  { %2233 = vmatpush3.bf16.msra.mxu1 %v921_v48  ;;  %2394 = vpow2.f32 %v904_v0 }
 0x6f4   :  { %2244 = vmatprep.subr.bf16.mxu1 %v2476_v36 }
 0x6f5   :  { %v1138_v54 = vpop.permute.xlu0 %1137 }
 0x6ff   :  { %v2393_v49 = vpop.eup %2392 }
 0x700   :  { %v910_v43 = vsel %vm358_vm2, %v2393_v49, 0.0  ;;  %v914_v51 = vpack.c.bf16 %v2393_v49, %v2393_v49  ;;  %v2395_v1 = vpop.eup %2394  ;;  %v1135_v49 = vld [vmem:[#allocation3] sm:$0xf] }
 0x701   :  { %911 = vadd.xlane.f32.xlu1 %v910_v43  ;;  %v909_v3 = vmul.f32 0.0, %v2395_v1  ;;  %v1254_v43 = vld [vmem:[#allocation3 + $0x4] sm:$0xf] }
 0x702   :  { %2235 = vmatmul.mubr.msk.bf16.vlgmr.msra.gmra.mxu1 %vm358_vm2, %v914_v51  ;;  %v1259_v51 = vsel %vm425_vm3, %v1254_v43, 0 }
 0x703   :  { %2245 = vmatpush3.bf16.xpose.msra.mxu1 %v1026_v50  ;;  %2246 = vmatprep.mubr.msk.bf16.mxu1 %vm2477_vm1, %v2476_v36  ;;  %v1305_v50 = vsel %vm425_vm3, %v1135_v49, 0  ;;  %v1464_v49 = vld [vmem:[#allocation3 + $0x8] sm:$0xf] }
 0x704   :  { %2256 = vmatprep.subr.bf16.mxu1 %v2476_v36 }
 0x70a   :  { %2247 = vmatmul.mubr.msk.bf16.vlgmr.msra.gmra.mxu1 %vm358_vm2, %v2709_v40 }
 0x70b   :  { %2257 = vmatpush3.bf16.xpose.msra.mxu1 %v1145_v53  ;;  %2258 = vmatprep.mubr.msk.bf16.mxu1 %vm2477_vm1, %v2476_v36 }
 0x70c   :  { %2268 = vmatprep.subr.bf16.mxu1 %v2476_v36 }
 0x712   :  { %2259 = vmatmul.mubr.msk.bf16.vlgmr.msra.gmra.mxu1 %vm358_vm2, %v1138_v54  ;;  %1083 = vrot.lane.b32.xlu1 %v2696_v18, %s2482_s13 }
 0x713   :  { %2270 = vmatprep.mubr.msk.bf16.mxu1 %vm2477_vm1, %v2476_v36  ;;  %2269 = vmatpush3.bf16.msra.mxu1 %v1259_v51 }
 0x714   :  { %2280 = vmatprep.subr.bf16.mxu1 %v2476_v36 }
 0x721   :  { %v843_v55 = vpop.f32.mrf.mxu1 }
 0x722   :  { %v2733_v56 = vadd.f32 %v843_v55, %v2674_v59 }
 0x723   :  { %v2224_v57 = vpop.f32.mrf.mxu1 }
 0x725   :  { %v846_v58 = vpop.f32.mrf.mxu1 }
 0x727   :  { %v2225_v60 = vpop.f32.mrf.mxu1 }
 0x78a   :  { %v912_v2 = vpop.xlane.xlu1 %911 }
 0x78b   :  { %v913_v4 = vadd.f32 %v912_v2, %v909_v3 }
 0x78d   :  { %2396 = vrcp.f32 %v913_v4 }
 0x78e   :  { %v1084_v24 = vpop.permute.xlu1 %1083 }
 0x78f   :  { %v1089_v25 = vsel %vm425_vm3, %v1084_v24, 0 }
 0x79a   :  { %v2397_v6 = vpop.eup %2396 }
 0x7c2   :  { %v957_v5 = vpop.f32.mrf.mxu1 }
 0x7c3   :  { %v963_v59 = vadd.f32 %v957_v5, %v909_v3 }
 0x7c4   :  { %v2236_v7 = vpop.f32.mrf.mxu1 }
 0x7c5   :  { %v965_v8 = vmul.f32 %v2397_v6, %v963_v59 }
 0x7c6   :  { %v960_v9 = vpop.f32.mrf.mxu1 }
 0x7c7   :  { %v966_v10 = vpack.c.bf16 %v965_v8, %v965_v8 }
 0x7c8   :  { %v2237_v11 = vpop.f32.mrf.mxu1 }
 0x7c9   :  { %2241 = vmatmul.mubr.msk.bf16.vlgmr.msra.gmra.mxu0 %vm358_vm2, %v966_v10 }
 0x7ca   :  { %v1062_v12 = vpop.f32.mrf.mxu1  ;;  %2252 = vmatprep.mubr.msk.bf16.mxu0 %vm2477_vm1, %v2476_v36  ;;  %2251 = vmatpush3.bf16.msra.mxu0 %v1089_v25 }
 0x7cb   :  { %v1068_v13 = vsel %vm358_vm2, %v1062_v12, -inf  ;;  %2262 = vmatprep.subr.bf16.mxu0 %v2476_v36 }
 0x7cc   :  { %1069 = vmax.xlane.f32.xlu0 %v1068_v13  ;;  %v2248_v45 = vpop.f32.mrf.mxu1 }
 0x7ce   :  { %v1065_v14 = vpop.f32.mrf.mxu1 }
 0x7d0   :  { %v2249_v15 = vpop.f32.mrf.mxu1 }
 0x7d2   :  { %v1181_v19 = vpop.f32.mrf.mxu1 }
 0x7d3   :  { %v1187_v20 = vsel %vm358_vm2, %v1181_v19, -inf }
 0x7d4   :  { %1188 = vmax.xlane.f32.xlu0 %v1187_v20  ;;  %v2260_v21 = vpop.f32.mrf.mxu1 }
 0x7d6   :  { %v1184_v22 = vpop.f32.mrf.mxu1 }
 0x7d8   :  { %v2261_v23 = vpop.f32.mrf.mxu1 }
 0x7ea   :  { %1202 = vrot.lane.b32.xlu0 %v2696_v18, %s2481_s12 }
 0x7ee   :  { %1349 = vrot.lane.b32.xlu0 %v2696_v18, %s2483_s14 }
 0x7f2   :  { %1347 = vrot.lane.b32.xlu0 %v2709_v40, %s2484_s15 }
 0x855   :  { %v1070_v26 = vpop.xlane.xlu0 %1069 }
 0x856   :  { %v1074_v27 = vsub.f32 %v1062_v12, %v1070_v26  ;;  %v1071_v52 = vsub.f32 -inf, %v1070_v26 }
 0x858   :  { %v1075_v28 = vmul.f32 1.442695, %v1074_v27  ;;  %v1072_v53 = vmul.f32 1.442695, %v1071_v52 }
 0x85a   :  { %2398 = vpow2.f32 %v1075_v28 }
 0x85d   :  { %v1189_v29 = vpop.xlane.xlu0 %1188 }
 0x85e   :  { %v1193_v30 = vsub.f32 %v1181_v19, %v1189_v29  ;;  %v1190_v54 = vsub.f32 -inf, %v1189_v29 }
 0x860   :  { %v1194_v31 = vmul.f32 1.442695, %v1193_v30 }
 0x861   :  { %v1203_v32 = vpop.permute.xlu0 %1202 }
 0x862   :  { %2400 = vpow2.f32 %v1194_v31  ;;  %v1208_v34 = vsel %vm425_vm3, %v1203_v32, 0 }
 0x863   :  { %2402 = vpow2.f32 %v1072_v53 }
 0x865   :  { %v1350_v55 = vpop.permute.xlu0 %1349 }
 0x866   :  { %v1355_v15 = vsel %vm358_vm2, %v1350_v55, 0 }
 0x867   :  { %v2399_v33 = vpop.eup %2398 }
 0x868   :  { %v1078_v35 = vsel %vm358_vm2, %v2399_v33, 0.0  ;;  %v1082_v37 = vpack.c.bf16 %v2399_v33, %v2399_v33 }
 0x869   :  { %1079 = vadd.xlane.f32.xlu0 %v1078_v35  ;;  %v1348_v57 = vpop.permute.xlu0 %1347 }
 0x86a   :  { %2253 = vmatmul.mubr.msk.bf16.vlgmr.msra.gmra.mxu0 %vm358_vm2, %v1082_v37 }
 0x86b   :  { %2263 = vmatpush3.bf16.msra.mxu0 %v1208_v34  ;;  %2264 = vmatprep.mubr.msk.bf16.mxu0 %vm2477_vm1, %v2476_v36 }
 0x86c   :  { %2274 = vmatprep.subr.bf16.mxu0 %v2476_v36 }
 0x86f   :  { %v2401_v38 = vpop.eup %2400 }
 0x870   :  { %v1197_v39 = vsel %vm358_vm2, %v2401_v38, 0.0  ;;  %v1201_v42 = vpack.c.bf16 %v2401_v38, %v2401_v38  ;;  %v2403_v58 = vpop.eup %2402 }
 0x871   :  { %1198 = vadd.xlane.f32.xlu1 %v1197_v39  ;;  %v1077_v61 = vmul.f32 0.0, %v2403_v58 }
 0x872   :  { %2265 = vmatmul.mubr.msk.bf16.vlgmr.msra.gmra.mxu0 %vm358_vm2, %v1201_v42 }
 0x873   :  { %2276 = vmatprep.mubr.msk.bf16.mxu0 %vm2477_vm1, %v2476_v36  ;;  %2275 = vmatpush3.bf16.msra.mxu0 %v1305_v50  ;;  %v1469_v50 = vsel %vm425_vm3, %v1464_v49, 0 }
 0x874   :  { %2286 = vmatprep.subr.bf16.mxu0 %v2476_v36 }
 0x87f   :  { %1514 = vrot.lane.b32.xlu0 %v2696_v18, %s2485_s2 }
 0x889   :  { %v1008_v44 = vpop.f32.mrf.mxu0 }
 0x88a   :  { %v1014_v46 = vadd.f32 %v1008_v44, %v2733_v56  ;;  %v1191_v56 = vmul.f32 1.442695, %v1190_v54 }
 0x88b   :  { %v2242_v47 = vpop.f32.mrf.mxu0 }
 0x88c   :  { %1015 = vst.msk [vmem:[#allocation6] sm:$0xff] %vm252_vm0, %v1014_v46  ;;  %2404 = vpow2.f32 %v1191_v56 }
 0x88d   :  { %v1011_v48 = vpop.f32.mrf.mxu0 }
 0x88f   :  { %v2243_v41 = vpop.f32.mrf.mxu0 }
 0x899   :  { %v2405_v63 = vpop.eup %2404 }
 0x89a   :  { %v1196_v1 = vmul.f32 0.0, %v2405_v63 }
 0x8f2   :  { %v1080_v60 = vpop.xlane.xlu0 %1079 }
 0x8f3   :  { %v1081_v62 = vadd.f32 %v1080_v60, %v1077_v61 }
 0x8f5   :  { %2406 = vrcp.f32 %v1081_v62 }
 0x8f6   :  { %v1515_v44 = vpop.permute.xlu0 %1514 }
 0x8f7   :  { %v1520_v47 = vsel %vm358_vm2, %v1515_v44, 0 }
 0x8fa   :  { %v1199_v0 = vpop.xlane.xlu1 %1198 }
 0x8fb   :  { %v1200_v2 = vadd.f32 %v1199_v0, %v1196_v1 }
 0x8fd   :  { %2408 = vrcp.f32 %v1200_v2 }
 0x902   :  { %v2407_v5 = vpop.eup %2406 }
 0x90a   :  { %v2409_v12 = vpop.eup %2408 }
 0x92a   :  { %v1125_v3 = vpop.f32.mrf.mxu0 }
 0x92b   :  { %v1131_v4 = vadd.f32 %v1125_v3, %v1077_v61 }
 0x92c   :  { %v2254_v59 = vpop.f32.mrf.mxu0 }
 0x92d   :  { %v1133_v6 = vmul.f32 %v2407_v5, %v1131_v4 }
 0x92e   :  { %v1128_v7 = vpop.f32.mrf.mxu0 }
 0x92f   :  { %v1134_v8 = vpack.c.bf16 %v1133_v6, %v1133_v6 }
 0x930   :  { %v2255_v9 = vpop.f32.mrf.mxu0 }
 0x931   :  { %2277 = vmatmul.mubr.msk.bf16.vlgmr.msra.gmra.mxu0 %vm358_vm2, %v1134_v8  ;;  %v1678_v9 = vld [vmem:[#allocation6] sm:$0xff] }
 0x932   :  { %v1244_v10 = vpop.f32.mrf.mxu0  ;;  %2288 = vmatprep.mubr.msk.bf16.mxu0 %vm2477_vm1, %v2476_v36 }
 0x933   :  { %v1250_v11 = vadd.f32 %v1244_v10, %v1196_v1  ;;  %v2807_v10 = vadd.f32 %v1678_v9, %v2583_v16 }
 0x934   :  { %v2266_v13 = vpop.f32.mrf.mxu0 }
 0x935   :  { %v1252_v45 = vmul.f32 %v2409_v12, %v1250_v11 }
 0x936   :  { %v1247_v14 = vpop.f32.mrf.mxu0 }
 0x937   :  { %v1253_v19 = vpack.c.bf16 %v1252_v45, %v1252_v45  ;;  %v1683_v45 = vmul.f32 %v2807_v10, %v2807_v10 }
 0x938   :  { %v2267_v20 = vpop.f32.mrf.mxu0 }
 0x939   :  { %2271 = vmatmul.mubr.msk.bf16.vlgmr.msra.gmra.mxu1 %vm358_vm2, %v1253_v19  ;;  %v1685_v14 = vsel %vm252_vm0, %v1683_v45, 0.0 }
 0x93a   :  { %2281 = vmatpush3.bf16.xpose.msra.mxu1 %v1355_v15  ;;  %2282 = vmatprep.mubr.msk.bf16.mxu1 %vm2477_vm1, %v2476_v36 }
 0x93b   :  { %2292 = vmatprep.subr.bf16.mxu1 %v2476_v36 }
 0x941   :  { %2283 = vmatmul.mubr.msk.bf16.vlgmr.msra.gmra.mxu1 %vm358_vm2, %v1348_v57 }
 0x942   :  { %2294 = vmatprep.mubr.msk.bf16.mxu1 %vm2477_vm1, %v2476_v36  ;;  %2293 = vmatpush3.bf16.msra.mxu1 %v1469_v50 }
 0x943   :  { %2304 = vmatprep.subr.bf16.mxu1 %v2476_v36 }
 0x9f1   :  { %v1341_v21 = vpop.f32.mrf.mxu0 }
 0x9f3   :  { %v2278_v22 = vpop.f32.mrf.mxu0 }
 0x9f5   :  { %v1344_v23 = vpop.f32.mrf.mxu0 }
 0x9f7   :  { %v2279_v24 = vpop.f32.mrf.mxu0 }
 0x9f9   :  { %v1295_v25 = vpop.f32.mrf.mxu1 }
 0x9fa   :  { %v2779_v26 = vadd.f32 %v1341_v21, %v1295_v25  ;;  %v1629_v21 = vld [vmem:[#allocation3 + $0xc] sm:$0xf] }
 0x9fb   :  { %v2272_v27 = vpop.f32.mrf.mxu1  ;;  %v1634_v22 = vsel %vm425_vm3, %v1629_v21, 0 }
 0x9fd   :  { %v1298_v28 = vpop.f32.mrf.mxu1 }
 0x9ff   :  { %v2273_v29 = vpop.f32.mrf.mxu1 }
 0xa01   :  { %v1391_v30 = vpop.f32.mrf.mxu1 }
 0xa02   :  { %v1397_v31 = vsel %vm358_vm2, %v1391_v30, -inf }
 0xa03   :  { %1398 = vmax.xlane.f32.xlu1 %v1397_v31  ;;  %v2284_v32 = vpop.f32.mrf.mxu1 }
 0xa05   :  { %v1394_v33 = vpop.f32.mrf.mxu1 }
 0xa07   :  { %v2285_v34 = vpop.f32.mrf.mxu1 }
 0xa14   :  { %1412 = vrot.lane.b32.xlu1 %v2696_v18, %s2486_s16 }
 0xa18   :  { %1512 = vrot.lane.b32.xlu1 %v2709_v40, %s2487_s17 }
 0xa8c   :  { %v1399_v35 = vpop.xlane.xlu1 %1398 }
 0xa8d   :  { %v1403_v37 = vsub.f32 %v1391_v30, %v1399_v35  ;;  %v1400_v43 = vsub.f32 -inf, %v1399_v35 }
 0xa8f   :  { %v1404_v38 = vmul.f32 1.442695, %v1403_v37  ;;  %v1401_v51 = vmul.f32 1.442695, %v1400_v43 }
 0xa90   :  { %v1413_v39 = vpop.permute.xlu1 %1412 }
 0xa91   :  { %v1418_v42 = vsel %vm425_vm3, %v1413_v39, 0  ;;  %2410 = vpow2.f32 %v1404_v38 }
 0xa92   :  { %2287 = vmatpush3.bf16.msra.mxu0 %v1418_v42  ;;  %2412 = vpow2.f32 %v1401_v51 }
 0xa93   :  { %2298 = vmatprep.subr.bf16.mxu0 %v2476_v36 }
 0xa94   :  { %v1513_v40 = vpop.permute.xlu1 %1512 }
 0xa9e   :  { %v2411_v46 = vpop.eup %2410 }
 0xa9f   :  { %v1407_v48 = vsel %vm358_vm2, %v2411_v46, 0.0  ;;  %v1411_v41 = vpack.c.bf16 %v2411_v46, %v2411_v46  ;;  %v2413_v52 = vpop.eup %2412 }
 0xaa0   :  { %1408 = vadd.xlane.f32.xlu1 %v1407_v48  ;;  %v1406_v54 = vmul.f32 0.0, %v2413_v52 }
 0xaa1   :  { %2289 = vmatmul.mubr.msk.bf16.vlgmr.msra.gmra.mxu0 %vm358_vm2, %v1411_v41 }
 0xaa2   :  { %2299 = vmatpush3.bf16.xpose.msra.mxu0 %v1520_v47  ;;  %2300 = vmatprep.mubr.msk.bf16.mxu0 %vm2477_vm1, %v2476_v36 }
 0xaa3   :  { %2310 = vmatprep.subr.bf16.mxu0 %v2476_v36 }
 0xaa9   :  { %2301 = vmatmul.mubr.msk.bf16.vlgmr.msra.gmra.mxu0 %vm358_vm2, %v1513_v40 }
 0xaaa   :  { %2312 = vmatprep.mubr.msk.bf16.mxu0 %vm2477_vm1, %v2476_v36  ;;  %2311 = vmatpush3.bf16.msra.mxu0 %v1634_v22 }
 0xab1   :  { %1577 = vrot.lane.b32.xlu1 %v2696_v18, %s2488_s18 }
 0xb29   :  { %v1409_v53 = vpop.xlane.xlu1 %1408 }
 0xb2a   :  { %v1410_v55 = vadd.f32 %v1409_v53, %v1406_v54 }
 0xb2c   :  { %2414 = vrcp.f32 %v1410_v55 }
 0xb2d   :  { %v1578_v5 = vpop.permute.xlu1 %1577 }
 0xb2e   :  { %v1583_v59 = vsel %vm425_vm3, %v1578_v5, 0 }
 0xb39   :  { %v2415_v58 = vpop.eup %2414 }
 0xb61   :  { %v1454_v56 = vpop.f32.mrf.mxu0 }
 0xb62   :  { %v1460_v57 = vadd.f32 %v1454_v56, %v1406_v54 }
 0xb63   :  { %v2290_v60 = vpop.f32.mrf.mxu0 }
 0xb64   :  { %v1462_v61 = vmul.f32 %v2415_v58, %v1460_v57 }
 0xb65   :  { %v1457_v18 = vpop.f32.mrf.mxu0 }
 0xb66   :  { %v1463_v62 = vpack.c.bf16 %v1462_v61, %v1462_v61 }
 0xb67   :  { %v2291_v63 = vpop.f32.mrf.mxu0 }
 0xb68   :  { %2295 = vmatmul.mubr.msk.bf16.vlgmr.msra.gmra.mxu1 %vm358_vm2, %v1463_v62 }
 0xb69   :  { %v1556_v0 = vpop.f32.mrf.mxu0  ;;  %2306 = vmatprep.mubr.msk.bf16.mxu1 %vm2477_vm1, %v2476_v36  ;;  %2305 = vmatpush3.bf16.msra.mxu1 %v1583_v59 }
 0xb6a   :  { %v1562_v1 = vsel %vm358_vm2, %v1556_v0, -inf }
 0xb6b   :  { %1563 = vmax.xlane.f32.xlu0 %v1562_v1  ;;  %v2302_v2 = vpop.f32.mrf.mxu0 }
 0xb6d   :  { %v1559_v3 = vpop.f32.mrf.mxu0 }
 0xb6f   :  { %v2303_v4 = vpop.f32.mrf.mxu0 }
 0xbf4   :  { %v1564_v6 = vpop.xlane.xlu0 %1563 }
 0xbf5   :  { %v1568_v7 = vsub.f32 %v1556_v0, %v1564_v6  ;;  %v1565_v24 = vsub.f32 -inf, %v1564_v6 }
 0xbf7   :  { %v1569_v8 = vmul.f32 1.442695, %v1568_v7  ;;  %v1566_v25 = vmul.f32 1.442695, %v1565_v24 }
 0xbf9   :  { %2416 = vpow2.f32 %v1569_v8 }
 0xbfa   :  { %2418 = vpow2.f32 %v1566_v25 }
 0xc06   :  { %v2417_v11 = vpop.eup %2416 }
 0xc07   :  { %v1572_v12 = vsel %vm358_vm2, %v2417_v11, 0.0  ;;  %v1576_v13 = vpack.c.bf16 %v2417_v11, %v2417_v11  ;;  %v2419_v27 = vpop.eup %2418 }
 0xc08   :  { %1573 = vadd.xlane.f32.xlu0 %v1572_v12  ;;  %v1571_v29 = vmul.f32 0.0, %v2419_v27 }
 0xc09   :  { %2307 = vmatmul.mubr.msk.bf16.vlgmr.msra.gmra.mxu1 %vm358_vm2, %v1576_v13 }
 0xc0c   :  { %1686 = vadd.xlane.f32.xlu0 %v1685_v14 }
 0xc28   :  { %v1505_v15 = vpop.f32.mrf.mxu1 }
 0xc29   :  { %v1511_v19 = vadd.f32 %v1505_v15, %v2779_v26 }
 0xc2a   :  { %v2296_v20 = vpop.f32.mrf.mxu1 }
 0xc2c   :  { %v1508_v16 = vpop.f32.mrf.mxu1 }
 0xc2e   :  { %v2297_v23 = vpop.f32.mrf.mxu1 }
 0xc91   :  { %v1574_v28 = vpop.xlane.xlu0 %1573 }
 0xc92   :  { %v1575_v30 = vadd.f32 %v1574_v28, %v1571_v29 }
 0xc94   :  { %2420 = vrcp.f32 %v1575_v30 }
 0xc95   :  { %v1687_v50 = vpop.xlane.xlu0 %1686 }
 0xc96   :  { %v1691_v43 = vmul.f32 0.03125, %v1687_v50 }
 0xc98   :  { %v1693_v51 = vadd.f32 1e-05, %v1691_v43 }
 0xc9a   :  { %2422 = vrsqrt.f32 %v1693_v51 }
 0xca1   :  { %v2421_v33 = vpop.eup %2420 }
 0xca7   :  { %v2423_v55 = vpop.eup %2422 }
 0xca8   :  { %v1697_v56 = vmul.f32 %v2423_v55, %v2807_v10 }
 0xcc9   :  { %v1619_v31 = vpop.f32.mrf.mxu1 }
 0xcca   :  { %v1625_v32 = vadd.f32 %v1619_v31, %v1571_v29 }
 0xccb   :  { %v2308_v34 = vpop.f32.mrf.mxu1 }
 0xccc   :  { %v1627_v26 = vmul.f32 %v2421_v33, %v1625_v32 }
 0xccd   :  { %v1622_v35 = vpop.f32.mrf.mxu1 }
 0xcce   :  { %v1628_v37 = vpack.c.bf16 %v1627_v26, %v1627_v26 }
 0xccf   :  { %v2309_v38 = vpop.f32.mrf.mxu1 }
 0xcd0   :  { %2313 = vmatmul.mubr.msk.bf16.vlgmr.msra.gmra.mxu0 %vm358_vm2, %v1628_v37 }
 0xd90   :  { %v1670_v39 = vpop.f32.mrf.mxu0 }
 0xd91   :  { %v1676_v42 = vadd.f32 %v1670_v39, %v1511_v19 }
 0xd92   :  { %v2314_v44 = vpop.f32.mrf.mxu0 }
 0xd93   :  { %1677 = vst.msk [vmem:[#allocation6 + $0x8] sm:$0xff] %vm252_vm0, %v1676_v42 }
 0xd94   :  { %v1673_v46 = vpop.f32.mrf.mxu0 }
 0xd96   :  { %v2315_v47 = vpop.f32.mrf.mxu0 }
 0xd9a   :  { %v1679_v48 = vld [vmem:[#allocation6 + $0x8] sm:$0xff] }
 0xd9b   :  { %v2819_v41 = vadd.f32 %v1679_v48, %v2588_v17  ;;  %v2077_v17 = vld [vmem:[%s2862_s6] ss:$0 sm:$0xff] }
 0xd9c   :  { %v1705_v60 = vmul.f32 %v2077_v17, %v1697_v56 }
 0xd9d   :  { %v1684_v40 = vmul.f32 %v2819_v41, %v2819_v41 }
 0xd9f   :  { %v1688_v49 = vsel %vm252_vm0, %v1684_v40, 0.0 }
 0xda0   :  { %1689 = vadd.xlane.f32.xlu0 %v1688_v49 }
 0xe29   :  { %v1690_v52 = vpop.xlane.xlu0 %1689 }
 0xe2a   :  { %v1692_v53 = vmul.f32 0.03125, %v1690_v52 }
 0xe2c   :  { %v1694_v54 = vadd.f32 1e-05, %v1692_v53 }
 0xe2e   :  { %2424 = vrsqrt.f32 %v1694_v54 }
 0xe3b   :  { %v2425_v57 = vpop.eup %2424 }
 0xe3c   :  { %v1698_v58 = vmul.f32 %v2425_v57, %v2819_v41 }
 0xe3e   :  { %v1706_v61 = vmul.f32 %v2077_v17, %v1698_v58 }
 0xe40   :  { %v1707_v18 = vpack.c.bf16 %v1706_v61, %v1705_v60 }
 0xe41   :  { %2470 = dma.done.wait [#allocation7 + $0x2], 512 }
 0xe42   :  { %2471 = vsyncadd [#allocation7 + $0x2], 4294966784 }
 0xe43   :  { %2472 = dma.done.wait [#allocation7 + $0x3], 1024 }
 0xe44   :  { %2473 = vsyncadd [#allocation7 + $0x3], 4294966272  ;;  %2316 = vmatprep.subr.bf16.mxu1 %v2476_v36  ;;  %2320 = vmatprep.mubr.msk.bf16.mxu1 %vm2477_vm1, %v2476_v36  ;;  %v2426_v62 = vld [vmem:[#allocation4 + $0x10] ss:$8 sps:$4 sm:$0xff]   ;;  %v2427_v63 = vld [vmem:[#allocation4] ss:$8 sps:$4 sm:$0xff]  }
 0xe45   :  { %2324 = vmatprep.subr.bf16.mxu0 %v2476_v36  ;;  %2328 = vmatprep.mubr.msk.bf16.mxu0 %vm2477_vm1, %v2476_v36  ;;  %v2428_v0 = vld [vmem:[#allocation4 + $0x14] ss:$8 sps:$4 sm:$0xff]   ;;  %v2429_v1 = vld [vmem:[#allocation4 + $0x4] ss:$8 sps:$4 sm:$0xff]   ;;  %s2489_s6 = smov [#allocation8]  }
 0xe46   :  { %2317 = vmatpush3.bf16.msra.mxu1 %v2426_v62  ;;  %2325 = vmatpush3.bf16.msra.mxu0 %v2428_v0  ;;  %v2430_v2 = vld [vmem:[#allocation5 + $0x38] sm:$0xff]   ;;  %v2431_v3 = vld [vmem:[#allocation5 + $0x30] sm:$0xff]   ;;  %v2432_v4 = vld [vmem:[#allocation5 + $0x28] sm:$0xff]   ;;  %s1973_s21 = sshll.u32 %s2489_s6, 4  ;;  %s1974_s21 = int_to_ptr.vmem [resolvable:$true] %s1973_s21 }
 0xe47   :  { %2318 = vmatprep.subr.bf16.mxu1 %v2476_v36  ;;  %2326 = vmatprep.subr.bf16.mxu0 %v2476_v36  ;;  %v2433_v5 = vld [vmem:[#allocation5 + $0x20] sm:$0xff]   ;;  %v2434_v59 = vld [vmem:[#allocation5 + $0x18] sm:$0xff]   ;;  %v2435_v6 = vld [vmem:[#allocation5 + $0x10] sm:$0xff]   ;;  %s2446_s22 = scalar_lea.vmem %s1974_s21, 256  ;;  %p2451_p1 = scmp.lt.s32.totalorder %s1974_s21, %s1974_s21 }
 0xe48   :  { %v2436_v7 = vld [vmem:[#allocation5 + $0x8] sm:$0xff]   ;;  %v2437_v8 = vld [vmem:[#allocation5] sm:$0xff]   ;;  %p2447_p0 = scmp.ne.s32.totalorder %s1974_s21, %s2446_s22  ;;  %p2452_p2 = scmp.lt.s32.totalorder %s2446_s22, %s2446_s22 }
 0xe4a   :  { %2319 = vmatpush3.bf16.msra.mxu1 %v2427_v63  ;;  %2327 = vmatpush3.bf16.msra.mxu0 %v2429_v1  ;;  %p2453_p3 = por %p2452_p2, %p2451_p1 }
 0xe4b   :  { %2332 = vmatprep.subr.bf16.mxu1 %v2476_v36 }
 0xe4c   :  { %p2454_p4 = pnand %p2453_p3, %p2447_p0 }
 0xe4d   :  { %2321 = vmatmul.mubr.msk.bf16.vlgmr.msra.gmra.mxu1 %vm252_vm0, %v1707_v18  ;;  %2329 = vmatmul.mubr.msk.bf16.vlgmr.msra.gmra.mxu0 %vm252_vm0, %v1707_v18 }
 0xe4e   :  { %2348 = vmatprep.mubr.msk.bf16.mxu1 %vm2477_vm1, %v2476_v36  ;;  %2333 = vmatpush3.bf16.msra.mxu1 %v2430_v2 }
 0xe4f   :  { %2334 = vmatprep.subr.bf16.mxu1 %v2476_v36 }
 0xe52   :  { %2335 = vmatpush3.bf16.msra.mxu1 %v2431_v3 }
 0xe53   :  { %2336 = vmatprep.subr.bf16.mxu1 %v2476_v36 }
 0xe56   :  { %2337 = vmatpush3.bf16.msra.mxu1 %v2432_v4 }
 0xe57   :  { %2338 = vmatprep.subr.bf16.mxu1 %v2476_v36 }
 0xe5a   :  { %2339 = vmatpush3.bf16.msra.mxu1 %v2433_v5 }
 0xe5b   :  { %2340 = vmatprep.subr.bf16.mxu1 %v2476_v36 }
 0xe5e   :  { %2341 = vmatpush3.bf16.msra.mxu1 %v2434_v59 }
 0xe5f   :  { %2342 = vmatprep.subr.bf16.mxu1 %v2476_v36 }
 0xe62   :  { %2343 = vmatpush3.bf16.msra.mxu1 %v2435_v6 }
 0xe63   :  { %2344 = vmatprep.subr.bf16.mxu1 %v2476_v36 }
 0xe66   :  { %2345 = vmatpush3.bf16.msra.mxu1 %v2436_v7 }
 0xe67   :  { %2346 = vmatprep.subr.bf16.mxu1 %v2476_v36 }
 0xe6a   :  { %2347 = vmatpush3.bf16.msra.mxu1 %v2437_v8 }
 0xf0d   :  { %v1774_v9 = vpop.f32.mrf.mxu1  ;;  %v1831_v13 = vpop.f32.mrf.mxu0 }
 0xf0e   :  { %v2084_v11 = vmul.f32 -1.442695, %v1774_v9 }
 0xf0f   :  { %v2322_v12 = vpop.f32.mrf.mxu1  ;;  %v2330_v14 = vpop.f32.mrf.mxu0 }
 0xf10   :  { %2438 = vpow2.f32 %v2084_v11 }
 0xf11   :  { %v1777_v45 = vpop.f32.mrf.mxu1  ;;  %v1834_v20 = vpop.f32.mrf.mxu0 }
 0xf12   :  { %v2085_v15 = vmul.f32 -1.442695, %v1777_v45 }
 0xf13   :  { %v2323_v19 = vpop.f32.mrf.mxu1  ;;  %v2331_v21 = vpop.f32.mrf.mxu0 }
 0xf14   :  { %2440 = vpow2.f32 %v2085_v15 }
 0xf1d   :  { %v2439_v16 = vpop.eup %2438 }
 0xf1e   :  { %v1844_v22 = vadd.f32 1.0, %v2439_v16 }
 0xf20   :  { %2442 = vrcp.f32 %v1844_v22 }
 0xf21   :  { %v2441_v23 = vpop.eup %2440 }
 0xf22   :  { %v1845_v24 = vadd.f32 1.0, %v2441_v23 }
 0xf24   :  { %2444 = vrcp.f32 %v1845_v24 }
 0xf2d   :  { %v2443_v36 = vpop.eup %2442 }
 0xf2e   :  { %v1850_v25 = vmul.f32 %v2443_v36, %v1774_v9 }
 0xf30   :  { %v1852_v29 = vmul.f32 %v1850_v25, %v1831_v13 }
 0xf31   :  { %v2445_v27 = vpop.eup %2444 }
 0xf32   :  { %v1851_v28 = vmul.f32 %v2445_v27, %v1777_v45 }
 0xf34   :  { %v1853_v30 = vmul.f32 %v1851_v28, %v1834_v20 }
 0xf36   :  { %v1854_v31 = vpack.c.bf16 %v1853_v30, %v1852_v29 }
 0xf38   :  { %2349 = vmatmul.mubr.bf16.vlgmr.msra.gmra.mxu1 %v1854_v31 }
 0xff8   :  { %v1953_v32 = vpop.f32.mrf.mxu1 }
 0xff9   :  { %v1960_v33 = vadd.f32 %v1953_v32, %v2807_v10 }
 0xffa   :  { %v2350_v34 = vpop.f32.mrf.mxu1 }
 0xffb   :  { %1962 = vst.msk [vmem:[#allocation8] sm:$0xff] %vm252_vm0, %v1960_v33 }
 0xffc   :  { %v1956_v26 = vpop.f32.mrf.mxu1 }
 0xffd   :  { %v1961_v35 = vadd.f32 %v1956_v26, %v2819_v41 }
 0xffe   :  { %v2351_v37 = vpop.f32.mrf.mxu1 }
 0xfff   :  { %1963 = vst.msk [vmem:[#allocation8 + $0x8] sm:$0xff] %vm252_vm0, %v1961_v35 }
0x1000   :  { %2457 = shalt.err (!%p2454_p4)
}
0x1001   :  { %s2490_s3 = smov 128   ;;  %s2491_s23 = smov 8  }
0x1002   :  { %1979 = dma.vmem_to_hbm [thread:$0]  %s1974_s21, 256, %s2863_s7, [#allocation9], %s2490_s3, %s2490_s3, %s2491_s23  }
0x1003   :  { %2474 = dma.done.wait [#allocation9], 256  }
0x1004   :  { %2475 = vsyncadd [#allocation9], 4294967040 }
0x1005   :  { %1983 = vsyncpa [#allocation9], 1 }
0x1006   :  { %1984 = vsyncmov [#allocation7] }
0x1009   :  { %s1985_s26 = vpop.sfrf %1984 }
0x100a   :  { %p2094_p5 = scmp.ne.s32.totalorder %s1985_s26, 0 }
0x100c   :  { %1989 = shalt.err (%p2094_p5)  }
0x100d   :  { %1991 = vsyncmov [#allocation7 + $0x1] }
0x1010   :  { %s1992_s27 = vpop.sfrf %1991 }
0x1011   :  { %p2095_p6 = scmp.ne.s32.totalorder %s1992_s27, 0 }
0x1013   :  { %1996 = shalt.err (%p2095_p6)  }
0x1014   :  { %1998 = vsyncmov [#allocation7 + $0x2] }
0x1017   :  { %s1999_s28 = vpop.sfrf %1998 }
0x1018   :  { %p2096_p7 = scmp.ne.s32.totalorder %s1999_s28, 0 }
0x101a   :  { %2003 = shalt.err (%p2096_p7)  }
0x101b   :  { %2005 = vsyncmov [#allocation7 + $0x3] }
0x101e   :  { %s2006_s29 = vpop.sfrf %2005 }
0x101f   :  { %p2097_p8 = scmp.ne.s32.totalorder %s2006_s29, 0 }
0x1021   :  { %2010 = shalt.err (%p2097_p8)  }

</bundles_post_ra>
